<compile_context>
chip_gen: v5e
topology: v5e:2x2
jax: 0.10.0
libtpu: 0.0.40
codegen_flags: <defaults>
</compile_context>

<pallas_src>
import math
from functools import partial

import numpy as np
import jax
import jax.numpy as jnp
from jax import lax
from jax.experimental import pallas as pl
from jax.experimental.pallas import tpu as pltpu


# ----------------------------- shared math helpers -----------------------------

def _layer_norm(x, w, b, eps=1e-5):
    mu = jnp.mean(x, axis=-1, keepdims=True)
    xc = x - mu
    var = jnp.mean(xc * xc, axis=-1, keepdims=True)
    return xc * lax.rsqrt(var + eps) * w + b


def _erf_poly(x):
    # Abramowitz & Stegun 7.1.26 (max abs err ~1.5e-7), built only from ops that are
    # guaranteed to lower on Mosaic (exp / mul / add / select) -- avoids lax.erf.
    a1, a2, a3, a4, a5 = 0.254829592, -0.284496736, 1.421413741, -1.453152027, 1.061405429
    p = 0.3275911
    ax = jnp.abs(x)
    t = 1.0 / (1.0 + p * ax)
    poly = ((((a5 * t + a4) * t + a3) * t + a2) * t + a1) * t
    y = 1.0 - poly * jnp.exp(-ax * ax)
    return jnp.where(x >= 0, y, -y)


def _gelu_kernel(x):
    # exact (erf) GELU to match torch.nn.functional.gelu default, via _erf_poly
    return 0.5 * x * (1.0 + _erf_poly(x * (1.0 / math.sqrt(2.0))))


def _gelu_exact(x):
    # reference-side exact GELU
    return 0.5 * x * (1.0 + lax.erf(x * (1.0 / math.sqrt(2.0))))


# ----------------------------- fused transformer-stack kernel -----------------------------

def _stack_kernel(x_ref, mask_ref,
                  wqkv_ref, bqkv_ref, wo_ref, bo_ref, ln1w_ref, ln1b_ref,
                  w1_ref, b1_ref, w2_ref, b2_ref, ln2w_ref, ln2b_ref,
                  flnw_ref, flnb_ref,
                  o_ref, x_scr, ctx_scr, *, num_heads, b_blk, seq_len):
    l = pl.program_id(1)
    n_layers = pl.num_programs(1)
    H = num_heads
    D = x_ref.shape[-1]
    hd = D // H
    N = b_blk * seq_len
    scale = jnp.float32(1.0 / math.sqrt(hd))

    # Load the batch block into the resident activation scratch on the first layer.
    @pl.when(l == 0)
    def _():
        x_scr[...] = x_ref[...].reshape(N, D).astype(jnp.float32)

    x = x_scr[...]                                   # (N, D) f32, resident across layers
    x_bf = x.astype(jnp.bfloat16)
    mask = mask_ref[...]                             # (S, S) additive causal bias

    # ---- fused full-width QKV projection: one (N,D)@(D,3D) MXU dot ----
    qkv = jnp.dot(x_bf, wqkv_ref[0],
                  preferred_element_type=jnp.float32) + bqkv_ref[0]   # (N, 3D) f32

    # ---- multi-head causal self-attention; per-head score matmuls are inherently
    #      hd-wide, so keep a small static head loop (H is small) and assemble the
    #      context into a lane-dense scratch for a single full-width out-projection.
    for h in range(H):
        qh = qkv[:, h * hd:(h + 1) * hd] * scale
        kh = qkv[:, D + h * hd: D + (h + 1) * hd]
        vh = qkv[:, 2 * D + h * hd: 2 * D + (h + 1) * hd]

        q3 = qh.reshape(b_blk, seq_len, hd).astype(jnp.bfloat16)
        k3 = kh.reshape(b_blk, seq_len, hd).astype(jnp.bfloat16)
        v3 = vh.reshape(b_blk, seq_len, hd).astype(jnp.bfloat16)

        s = jnp.einsum('bqd,bkd->bqk', q3, k3,
                       preferred_element_type=jnp.float32) + mask
        s = s - jnp.max(s, axis=-1, keepdims=True)
        p = jnp.exp(s)
        p = p * pl.reciprocal(jnp.sum(p, axis=-1, keepdims=True), approx=True)

        oh = jnp.einsum('bqk,bkd->bqd', p.astype(jnp.bfloat16), v3,
                        preferred_element_type=jnp.float32)
        ctx_scr[:, h * hd:(h + 1) * hd] = oh.reshape(N, hd)

    # single full-width output projection
    attn = jnp.dot(ctx_scr[...].astype(jnp.bfloat16), wo_ref[0],
                   preferred_element_type=jnp.float32) + bo_ref[0]

    # post-norm residual block 1 (norm_first=False default)
    h1 = _layer_norm(x + attn, ln1w_ref[0], ln1b_ref[0])

    # feed-forward (D -> 2D -> D) with exact GELU
    f = jnp.dot(h1.astype(jnp.bfloat16), w1_ref[0],
                preferred_element_type=jnp.float32) + b1_ref[0]
    f = _gelu_kernel(f)
    f = jnp.dot(f.astype(jnp.bfloat16), w2_ref[0],
                preferred_element_type=jnp.float32) + b2_ref[0]

    # post-norm residual block 2
    h2 = _layer_norm(h1 + f, ln2w_ref[0], ln2b_ref[0])

    x_scr[...] = h2                                  # stays resident for the next layer

    # last layer: fold the final LayerNorm in and emit bf16 (halves HBM writeback)
    @pl.when(l == n_layers - 1)
    def _():
        y = _layer_norm(h2, flnw_ref[...], flnb_ref[...])
        o_ref[...] = y.reshape(b_blk, seq_len, D).astype(o_ref.dtype)


# ----------------------------- vocab projection kernel -----------------------------

def _head_kernel(x_ref, wout_ref, o_ref, *, b_blk, seq_len):
    D = x_ref.shape[-1]
    x = x_ref[...].reshape(b_blk * seq_len, D)        # bf16, already final-LayerNormed
    logits = jnp.dot(x, wout_ref[...], preferred_element_type=jnp.float32)
    o_ref[...] = logits.reshape(b_blk, seq_len, -1).astype(o_ref.dtype)


# ----------------------------- sizing helpers -----------------------------

def _vmem_limit_bytes():
    try:
        cap = int(pltpu.get_tpu_info().vmem_capacity_bytes)
    except Exception:
        cap = 64 * 1024 * 1024            # conservative fallback (fits every generation)
    # v7x (64 MiB physical) -> ~56 MiB budget; v5e/v6e (128 MiB) -> ~112 MiB budget
    return int(min(cap - 8 * 1024 * 1024, cap * 7 // 8))


def _pick_b_blk(B, S, D, F, vmem_limit):
    def footprint(bb):
        n = bb * S
        act = 2 * n * D * 2 * 2                       # in + out blocks, bf16, double-buffered
        scr = 2 * n * D * 4                           # x_scr + ctx_scr (f32)
        vals = n * 3 * D * 4 + 3 * bb * S * S * 4 + 2 * n * F * 4
        wts = 2 * ((4 * D * D + 2 * D * F) * 2 + (8 * D + F) * 4)
        return act + scr + vals + wts

    bb = B
    while bb > 1 and (B % bb != 0 or bb * S > 2048 or footprint(bb) > 0.6 * vmem_limit):
        bb -= 1
    # keep >= 2 batch blocks so both v7x TensorCores get work on the parallel axis
    if B // bb < 2 and B >= 2:
        bb2 = bb // 2
        while bb2 > 1 and B % bb2 != 0:
            bb2 -= 1
        bb = max(bb2, 1)
    return max(bb, 1)


def _pick_head_b_blk(B, S, V, tv):
    bb = B
    while bb > 1 and (B % bb != 0 or bb * S > 4096):
        bb -= 1
    if V // tv < 2 and B // bb < 2 and B >= 2:        # give the second TC something to do
        bb2 = bb // 2
        while bb2 > 1 and B % bb2 != 0:
            bb2 -= 1
        bb = max(bb2, 1)
    return max(bb, 1)


def _pick_v_tile(V, target=2048, mult=128):
    if V % mult != 0:
        return V
    best, t = mult, mult
    while t <= min(V, target):
        if V % t == 0:
            best = t
        t += mult
    return best


# ----------------------------- pallas_call wrappers -----------------------------

_WEIGHT_NAMES = ('wqkv', 'bqkv', 'wo', 'bo', 'ln1_w', 'ln1_b',
                 'w1', 'b1', 'w2', 'b2', 'ln2_w', 'ln2_b')


def transformer_stack(x, neg_mask, params, num_heads, b_blk, vmem_limit):
    B, S, D = x.shape
    L = params['wqkv'].shape[0]
    F = params['w1'].shape[-1]
    nb = B // b_blk
    H = num_heads

    weights = [params[n] for n in _WEIGHT_NAMES]

    def wspec(a):
        nrest = a.ndim - 1
        return pl.BlockSpec((1,) + a.shape[1:],
                            lambda b, l, _n=nrest: (l,) + (0,) * _n)

    Ntok = B * S
    flops = int(L * (2 * Ntok * D * 3 * D + 2 * Ntok * D * D
                     + 4 * Ntok * D * F + 4 * Ntok * S * D))
    transcend = int(L * (B * H * S * S + Ntok * F + 4 * Ntok))
    w_bytes = int(L * ((4 * D * D + 2 * D * F) * 2 + (8 * D + F) * 4))
    bytes_acc = int(Ntok * D * 2 * 2 + nb * w_bytes + S * S * 4)

    return pl.pallas_call(
        partial(_stack_kernel, num_heads=num_heads, b_blk=b_blk, seq_len=S),
        out_shape=jax.ShapeDtypeStruct((B, S, D), jnp.bfloat16),
        grid=(nb, L),
        in_specs=[pl.BlockSpec((b_blk, S, D), lambda b, l: (b, 0, 0)),
                  pl.BlockSpec((S, S), lambda b, l: (0, 0))]
                 + [wspec(w) for w in weights]
                 + [pl.BlockSpec((1, D), lambda b, l: (0, 0)),
                    pl.BlockSpec((1, D), lambda b, l: (0, 0))],
        out_specs=pl.BlockSpec((b_blk, S, D), lambda b, l: (b, 0, 0)),
        scratch_shapes=[pltpu.VMEM((b_blk * S, D), jnp.float32),   # resident activation
                        pltpu.VMEM((b_blk * S, D), jnp.float32)],  # per-head context assembly
        compiler_params=pltpu.CompilerParams(
            dimension_semantics=("parallel", "arbitrary"),
            vmem_limit_bytes=vmem_limit),
        cost_estimate=pl.CostEstimate(flops=flops, transcendentals=transcend,
                                      bytes_accessed=bytes_acc),
    )(x, neg_mask, *weights, params['final_ln_w'], params['final_ln_b'])


def final_head(x, params, vmem_limit):
    B, S, D = x.shape
    V = params['w_out_t'].shape[1]
    tv = _pick_v_tile(V)
    b_blk = _pick_head_b_blk(B, S, V, tv)
    nb, nv = B // b_blk, V // tv

    return pl.pallas_call(
        partial(_head_kernel, b_blk=b_blk, seq_len=S),
        out_shape=jax.ShapeDtypeStruct((B, S, V), jnp.float32),
        grid=(nv, nb),          # vocab tile outer -> (D, tv) weight block streamed once per tile
        in_specs=[pl.BlockSpec((b_blk, S, D), lambda v, b: (b, 0, 0)),
                  pl.BlockSpec((D, tv), lambda v, b: (0, v))],
        out_specs=pl.BlockSpec((b_blk, S, tv), lambda v, b: (b, 0, v)),
        compiler_params=pltpu.CompilerParams(
            dimension_semantics=("parallel", "parallel"),
            vmem_limit_bytes=vmem_limit),
        cost_estimate=pl.CostEstimate(
            flops=int(2 * B * S * D * V), transcendentals=0,
            bytes_accessed=int(B * S * D * 2 * nv + D * V * 2 + B * S * V * 4)),
    )(x, params['w_out_t'])


def forward(params, input_ids, num_heads):
    B, S = input_ids.shape
    D = params['tok_emb'].shape[1]
    F = params['w1'].shape[-1]
    assert D % num_heads == 0

    # embedding gathers are glue (plain JAX); dropout is identity at inference
    tok = params['tok_emb'][input_ids]                     # (B, S, D)
    pos = params['pos_emb'][:S][None, :, :]                # (1, S, D)
    x = (tok + pos).astype(jnp.bfloat16)                   # bf16 input halves activation DMA

    # additive causal mask (kept in f32: -1e30 would overflow bf16), computed once
    keep = jnp.tril(jnp.ones((S, S), jnp.bool_))
    neg_mask = jnp.where(keep, 0.0, -1e30).astype(jnp.float32)

    vmem_limit = _vmem_limit_bytes()
    b_blk = _pick_b_blk(B, S, D, F, vmem_limit)
    x = transformer_stack(x, neg_mask, params, num_heads, b_blk, vmem_limit)
    return final_head(x, params, vmem_limit)


# ----------------------------- deterministic parameter init -----------------------------

def init_params(key, vocab_size, model_dim, num_layers, num_heads, max_seq_len):
    D, F, V = model_dim, 2 * model_dim, vocab_size
    keys = iter(jax.random.split(key, 5 + 12 * num_layers))

    def nrm(shape, std=0.02):
        return (std * jax.random.normal(next(keys), shape)).astype(jnp.float32)

    params = {
        'tok_emb': nrm((V, D)),
        'pos_emb': nrm((max_seq_len, D)),
        'w_out_t': nrm((V, D)).T.astype(jnp.bfloat16),       # Linear(D,V,bias=False): x @ W.T
        'final_ln_w': 1.0 + nrm((1, D)),
        'final_ln_b': nrm((1, D)),
    }

    acc = {n: [] for n in _WEIGHT_NAMES}
    for _ in range(num_layers):
        in_proj = nrm((3 * D, D))                 # PyTorch in_proj_weight layout (3D, D)
        acc['wqkv'].append(in_proj.T)             # (D, 3D): x @ wqkv -> [q | k | v] lane-dense
        acc['bqkv'].append(nrm((1, 3 * D)))       # small random biases -> stronger check
        acc['wo'].append(nrm((D, D)).T)           # out_proj.weight.T
        acc['bo'].append(nrm((1, D)))
        acc['ln1_w'].append(1.0 + nrm((1, D)))
        acc['ln1_b'].append(nrm((1, D)))
        acc['w1'].append(nrm((F, D)).T)           # linear1.weight.T -> (D, F)
        acc['b1'].append(nrm((1, F)))
        acc['w2'].append(nrm((D, F)).T)           # linear2.weight.T -> (F, D)
        acc['b2'].append(nrm((1, D)))
        acc['ln2_w'].append(1.0 + nrm((1, D)))
        acc['ln2_b'].append(nrm((1, D)))

    bf16_names = {'wqkv', 'wo', 'w1', 'w2'}                  # matmul inputs in bf16
    for n, lst in acc.items():
        params[n] = jnp.stack(lst).astype(jnp.bfloat16 if n in bf16_names else jnp.float32)
    return params


# ----------------------------- plain-JAX reference (same precision policy) -----------------------------

def _mm(a, b):
    return jnp.matmul(a.astype(jnp.bfloat16), b.astype(jnp.bfloat16),
                      preferred_element_type=jnp.float32)


def reference_forward(params, input_ids, num_heads):
    B, S = input_ids.shape
    D = params['tok_emb'].shape[1]
    H = num_heads
    hd = D // H
    L = params['wqkv'].shape[0]
    scale = 1.0 / math.sqrt(hd)
    keep = jnp.tril(jnp.ones((S, S), bool))

    x = (params['tok_emb'][input_ids] + params['pos_emb'][:S][None])
    x = x.astype(jnp.bfloat16).astype(jnp.float32)
    for l in range(L):
        qkv = _mm(x, params['wqkv'][l]) + params['bqkv'][l]
        q = qkv[..., :D] * scale
        k = qkv[..., D:2 * D]
        v = qkv[..., 2 * D:]
        q4 = q.reshape(B, S, H, hd).astype(jnp.bfloat16)
        k4 = k.reshape(B, S, H, hd).astype(jnp.bfloat16)
        v4 = v.reshape(B, S, H, hd).astype(jnp.bfloat16)
        s = jnp.einsum('bqhd,bkhd->bhqk', q4, k4, preferred_element_type=jnp.float32)
        s = jnp.where(keep[None, None], s, -1e30)
        p = jax.nn.softmax(s, axis=-1)
        o = jnp.einsum('bhqk,bkhd->bqhd', p.astype(jnp.bfloat16), v4,
                       preferred_element_type=jnp.float32)
        ctx = o.reshape(B, S, D)
        attn = _mm(ctx, params['wo'][l]) + params['bo'][l]
        h1 = _layer_norm(x + attn, params['ln1_w'][l], params['ln1_b'][l])
        f = _gelu_exact(_mm(h1, params['w1'][l]) + params['b1'][l])
        f = _mm(f, params['w2'][l]) + params['b2'][l]
        x = _layer_norm(h1 + f, params['ln2_w'][l], params['ln2_b'][l])
    y = _layer_norm(x, params['final_ln_w'], params['final_ln_b'])
    return _mm(y, params['w_out_t'])


# ----------------------------- main -----------------------------

if __name__ == "__main__":
    vocab_size, model_dim, num_layers, num_heads, max_seq_len = 128, 32, 2, 4, 64
    B, S = 2, 8

    key = jax.random.PRNGKey(0)
    pkey, ikey = jax.random.split(key)
    params = init_params(pkey, vocab_size, model_dim, num_layers, num_heads, max_seq_len)
    input_ids = jax.random.randint(ikey, (B, S), 0, vocab_size, dtype=jnp.int32)

    logits = jax.block_until_ready(forward(params, input_ids, num_heads))
    assert logits.shape == (B, S, vocab_size)

    ref = jax.block_until_ready(reference_forward(params, input_ids, num_heads))
    np.testing.assert_allclose(np.asarray(logits), np.asarray(ref), rtol=5e-3, atol=5e-3)
    print("KERNEL_OK")
</pallas_src>

<mosaic_0001>
module attributes {stable_mosaic.version = 11 : i64} {
  func.func @_stack_kernel(%arg0: i32, %arg1: i32, %arg2: memref<1x8x32xbf16, #tpu.memory_space<vmem>>, %arg3: memref<8x8xf32, #tpu.memory_space<vmem>>, %arg4: memref<1x32x96xbf16, #tpu.memory_space<vmem>>, %arg5: memref<1x1x96xf32, #tpu.memory_space<vmem>>, %arg6: memref<1x32x32xbf16, #tpu.memory_space<vmem>>, %arg7: memref<1x1x32xf32, #tpu.memory_space<vmem>>, %arg8: memref<1x1x32xf32, #tpu.memory_space<vmem>>, %arg9: memref<1x1x32xf32, #tpu.memory_space<vmem>>, %arg10: memref<1x32x64xbf16, #tpu.memory_space<vmem>>, %arg11: memref<1x1x64xf32, #tpu.memory_space<vmem>>, %arg12: memref<1x64x32xbf16, #tpu.memory_space<vmem>>, %arg13: memref<1x1x32xf32, #tpu.memory_space<vmem>>, %arg14: memref<1x1x32xf32, #tpu.memory_space<vmem>>, %arg15: memref<1x1x32xf32, #tpu.memory_space<vmem>>, %arg16: memref<1x32xf32, #tpu.memory_space<vmem>>, %arg17: memref<1x32xf32, #tpu.memory_space<vmem>>, %arg18: memref<1x8x32xbf16, #tpu.memory_space<vmem>>, %arg19: memref<8x32xf32, #tpu.memory_space<vmem>>, %arg20: memref<8x32xf32, #tpu.memory_space<vmem>>) attributes {dimension_semantics = [#tpu.dimension_semantics<parallel>, #tpu.dimension_semantics<arbitrary>], iteration_bounds = array<i64: 2, 2>, scalar_prefetch = 0 : i64, scratch_operands = 2 : i64, tpu.core_type = #tpu.core_type<tc>, window_params = [{transform_indices = @transform_0, window_bounds = array<i64: 1, 8, 32>}, {pipeline_mode = #tpu.pipeline_mode<synchronous>, transform_indices = @transform_1, window_bounds = array<i64: 8, 8>}, {transform_indices = @transform_2, window_bounds = array<i64: 1, 32, 96>}, {transform_indices = @transform_3, window_bounds = array<i64: 1, 1, 96>}, {transform_indices = @transform_4, window_bounds = array<i64: 1, 32, 32>}, {transform_indices = @transform_5, window_bounds = array<i64: 1, 1, 32>}, {transform_indices = @transform_6, window_bounds = array<i64: 1, 1, 32>}, {transform_indices = @transform_7, window_bounds = array<i64: 1, 1, 32>}, {transform_indices = @transform_8, window_bounds = array<i64: 1, 32, 64>}, {transform_indices = @transform_9, window_bounds = array<i64: 1, 1, 64>}, {transform_indices = @transform_10, window_bounds = array<i64: 1, 64, 32>}, {transform_indices = @transform_11, window_bounds = array<i64: 1, 1, 32>}, {transform_indices = @transform_12, window_bounds = array<i64: 1, 1, 32>}, {transform_indices = @transform_13, window_bounds = array<i64: 1, 1, 32>}, {pipeline_mode = #tpu.pipeline_mode<synchronous>, transform_indices = @transform_14, window_bounds = array<i64: 1, 32>}, {pipeline_mode = #tpu.pipeline_mode<synchronous>, transform_indices = @transform_15, window_bounds = array<i64: 1, 32>}, {transform_indices = @transform_16, window_bounds = array<i64: 1, 8, 32>}]} {
    %c0_i32 = arith.constant 0 : i32
    %0 = arith.cmpi eq, %arg1, %c0_i32 : i32
    %1 = arith.extui %0 : i1 to i32
    %c0_i32_0 = arith.constant 0 : i32
    %2 = arith.cmpi ne, %1, %c0_i32_0 : i32
    scf.if %2 {
      %c0_98 = arith.constant 0 : index
      %c0_99 = arith.constant 0 : index
      %c0_100 = arith.constant 0 : index
      %244 = vector.load %arg2[%c0_98, %c0_99, %c0_100] : memref<1x8x32xbf16, #tpu.memory_space<vmem>>, vector<1x8x32xbf16>
      %245 = vector.shape_cast %244 : vector<1x8x32xbf16> to vector<8x32xbf16>
      %246 = arith.extf %245 : vector<8x32xbf16> to vector<8x32xf32>
      %c0_101 = arith.constant 0 : index
      %c0_102 = arith.constant 0 : index
      %247 = vector.load %arg19[%c0_101, %c0_102] : memref<8x32xf32, #tpu.memory_space<vmem>>, vector<8x32xf32>
      tpu.vector_store %arg19[%c0_101, %c0_102], %246 {strides = array<i32>} : memref<8x32xf32, #tpu.memory_space<vmem>>, vector<8x32xf32>,
    } else {
    }
    %c0 = arith.constant 0 : index
    %c0_1 = arith.constant 0 : index
    %3 = vector.load %arg19[%c0, %c0_1] : memref<8x32xf32, #tpu.memory_space<vmem>>, vector<8x32xf32>
    %4 = arith.truncf %3 : vector<8x32xf32> to vector<8x32xbf16>
    %c0_2 = arith.constant 0 : index
    %c0_3 = arith.constant 0 : index
    %5 = vector.load %arg3[%c0_2, %c0_3] : memref<8x8xf32, #tpu.memory_space<vmem>>, vector<8x8xf32>
    %c0_4 = arith.constant 0 : index
    %c0_5 = arith.constant 0 : index
    %c0_6 = arith.constant 0 : index
    %6 = vector.load %arg4[%c0_4, %c0_5, %c0_6] : memref<1x32x96xbf16, #tpu.memory_space<vmem>>, vector<1x32x96xbf16>
    %7 = vector.shape_cast %6 : vector<1x32x96xbf16> to vector<32x96xbf16>
    %cst = arith.constant dense<0.000000e+00> : vector<8x96xf32>
    %8 = tpu.matmul %4, %7, %cst {dimension_numbers = #tpu.dot_dimension_numbers<[1], [0], [0], [1], [0, 0, 1, 1], [], []>} : vector<8x32xbf16>, vector<32x96xbf16>, vector<8x96xf32> -> vector<8x96xf32>
    %c0_7 = arith.constant 0 : index
    %c0_8 = arith.constant 0 : index
    %c0_9 = arith.constant 0 : index
    %9 = vector.load %arg5[%c0_7, %c0_8, %c0_9] : memref<1x1x96xf32, #tpu.memory_space<vmem>>, vector<1x1x96xf32>
    %10 = vector.shape_cast %9 : vector<1x1x96xf32> to vector<1x96xf32>
    %11 = vector.broadcast %10 : vector<1x96xf32> to vector<8x96xf32>
    %12 = arith.addf %8, %11 : vector<8x96xf32>
    %13 = vector.extract_strided_slice %12 {offsets = [0, 0], sizes = [8, 8], strides = [1, 1]} : vector<8x96xf32> to vector<8x8xf32>
    %cst_10 = arith.constant 0.353553385 : f32
    %14 = vector.broadcast %cst_10 : f32 to vector<8x8xf32>
    %15 = arith.mulf %13, %14 : vector<8x8xf32>
    %16 = vector.extract_strided_slice %12 {offsets = [0, 32], sizes = [8, 8], strides = [1, 1]} : vector<8x96xf32> to vector<8x8xf32>
    %17 = vector.extract_strided_slice %12 {offsets = [0, 64], sizes = [8, 8], strides = [1, 1]} : vector<8x96xf32> to vector<8x8xf32>
    %18 = vector.shape_cast %15 : vector<8x8xf32> to vector<1x8x8xf32>
    %19 = arith.truncf %18 : vector<1x8x8xf32> to vector<1x8x8xbf16>
    %20 = vector.shape_cast %16 : vector<8x8xf32> to vector<1x8x8xf32>
    %21 = arith.truncf %20 : vector<1x8x8xf32> to vector<1x8x8xbf16>
    %22 = vector.shape_cast %17 : vector<8x8xf32> to vector<1x8x8xf32>
    %23 = arith.truncf %22 : vector<1x8x8xf32> to vector<1x8x8xbf16>
    "tpu.trace_start"() <{level = 10 : i32, message = "bqd,bkd->bqk"}> : () -> ()
    %cst_11 = arith.constant dense<0.000000e+00> : vector<1x8x8xf32>
    %24 = tpu.matmul %19, %21, %cst_11 {dimension_numbers = #tpu.dot_dimension_numbers<[2], [2], [1], [1], [0, 0, 0, 1, 1, 1], [0], [0]>} : vector<1x8x8xbf16>, vector<1x8x8xbf16>, vector<1x8x8xf32> -> vector<1x8x8xf32>
    "tpu.trace_stop"() : () -> ()
    %25 = vector.shape_cast %5 : vector<8x8xf32> to vector<1x8x8xf32>
    %26 = arith.addf %24, %25 : vector<1x8x8xf32>
    %cst_12 = arith.constant dense<0xFF800000> : vector<1x8xf32>
    %27 = vector.multi_reduction <maximumf>, %26, %cst_12 [2] : vector<1x8x8xf32> to vector<1x8xf32>
    %28 = vector.shape_cast %27 : vector<1x8xf32> to vector<1x8x1xf32>
    %29 = vector.broadcast %28 : vector<1x8x1xf32> to vector<1x8x8xf32>
    %30 = arith.subf %26, %29 : vector<1x8x8xf32>
    %31 = math.exp %30 : vector<1x8x8xf32>
    %cst_13 = arith.constant dense<0.000000e+00> : vector<1x8xf32>
    %32 = vector.multi_reduction <add>, %31, %cst_13 [2] : vector<1x8x8xf32> to vector<1x8xf32>
    %33 = vector.shape_cast %32 : vector<1x8xf32> to vector<1x8x1xf32>
    %34 = tpu.reciprocal %33 {approx = true} : vector<1x8x1xf32> -> vector<1x8x1xf32>
    %35 = vector.broadcast %34 : vector<1x8x1xf32> to vector<1x8x8xf32>
    %36 = arith.mulf %31, %35 : vector<1x8x8xf32>
    %37 = arith.truncf %36 : vector<1x8x8xf32> to vector<1x8x8xbf16>
    "tpu.trace_start"() <{level = 10 : i32, message = "bqk,bkd->bqd"}> : () -> ()
    %cst_14 = arith.constant dense<0.000000e+00> : vector<1x8x8xf32>
    %38 = tpu.matmul %37, %23, %cst_14 {dimension_numbers = #tpu.dot_dimension_numbers<[2], [1], [1], [2], [0, 0, 0, 1, 1, 2], [0], [0]>} : vector<1x8x8xbf16>, vector<1x8x8xbf16>, vector<1x8x8xf32> -> vector<1x8x8xf32>
    "tpu.trace_stop"() : () -> ()
    %39 = vector.shape_cast %38 : vector<1x8x8xf32> to vector<8x8xf32>
    %c0_15 = arith.constant 0 : index
    %c0_16 = arith.constant 0 : index
    %40 = vector.load %arg20[%c0_15, %c0_16] : memref<8x32xf32, #tpu.memory_space<vmem>>, vector<8x8xf32>
    tpu.vector_store %arg20[%c0_15, %c0_16], %39 {strides = array<i32>} : memref<8x32xf32, #tpu.memory_space<vmem>>, vector<8x8xf32>,
    %41 = vector.extract_strided_slice %12 {offsets = [0, 8], sizes = [8, 8], strides = [1, 1]} : vector<8x96xf32> to vector<8x8xf32>
    %cst_17 = arith.constant 0.353553385 : f32
    %42 = vector.broadcast %cst_17 : f32 to vector<8x8xf32>
    %43 = arith.mulf %41, %42 : vector<8x8xf32>
    %44 = vector.extract_strided_slice %12 {offsets = [0, 40], sizes = [8, 8], strides = [1, 1]} : vector<8x96xf32> to vector<8x8xf32>
    %45 = vector.extract_strided_slice %12 {offsets = [0, 72], sizes = [8, 8], strides = [1, 1]} : vector<8x96xf32> to vector<8x8xf32>
    %46 = vector.shape_cast %43 : vector<8x8xf32> to vector<1x8x8xf32>
    %47 = arith.truncf %46 : vector<1x8x8xf32> to vector<1x8x8xbf16>
    %48 = vector.shape_cast %44 : vector<8x8xf32> to vector<1x8x8xf32>
    %49 = arith.truncf %48 : vector<1x8x8xf32> to vector<1x8x8xbf16>
    %50 = vector.shape_cast %45 : vector<8x8xf32> to vector<1x8x8xf32>
    %51 = arith.truncf %50 : vector<1x8x8xf32> to vector<1x8x8xbf16>
    "tpu.trace_start"() <{level = 10 : i32, message = "bqd,bkd->bqk"}> : () -> ()
    %cst_18 = arith.constant dense<0.000000e+00> : vector<1x8x8xf32>
    %52 = tpu.matmul %47, %49, %cst_18 {dimension_numbers = #tpu.dot_dimension_numbers<[2], [2], [1], [1], [0, 0, 0, 1, 1, 1], [0], [0]>} : vector<1x8x8xbf16>, vector<1x8x8xbf16>, vector<1x8x8xf32> -> vector<1x8x8xf32>
    "tpu.trace_stop"() : () -> ()
    %53 = vector.shape_cast %5 : vector<8x8xf32> to vector<1x8x8xf32>
    %54 = arith.addf %52, %53 : vector<1x8x8xf32>
    %cst_19 = arith.constant dense<0xFF800000> : vector<1x8xf32>
    %55 = vector.multi_reduction <maximumf>, %54, %cst_19 [2] : vector<1x8x8xf32> to vector<1x8xf32>
    %56 = vector.shape_cast %55 : vector<1x8xf32> to vector<1x8x1xf32>
    %57 = vector.broadcast %56 : vector<1x8x1xf32> to vector<1x8x8xf32>
    %58 = arith.subf %54, %57 : vector<1x8x8xf32>
    %59 = math.exp %58 : vector<1x8x8xf32>
    %cst_20 = arith.constant dense<0.000000e+00> : vector<1x8xf32>
    %60 = vector.multi_reduction <add>, %59, %cst_20 [2] : vector<1x8x8xf32> to vector<1x8xf32>
    %61 = vector.shape_cast %60 : vector<1x8xf32> to vector<1x8x1xf32>
    %62 = tpu.reciprocal %61 {approx = true} : vector<1x8x1xf32> -> vector<1x8x1xf32>
    %63 = vector.broadcast %62 : vector<1x8x1xf32> to vector<1x8x8xf32>
    %64 = arith.mulf %59, %63 : vector<1x8x8xf32>
    %65 = arith.truncf %64 : vector<1x8x8xf32> to vector<1x8x8xbf16>
    "tpu.trace_start"() <{level = 10 : i32, message = "bqk,bkd->bqd"}> : () -> ()
    %cst_21 = arith.constant dense<0.000000e+00> : vector<1x8x8xf32>
    %66 = tpu.matmul %65, %51, %cst_21 {dimension_numbers = #tpu.dot_dimension_numbers<[2], [1], [1], [2], [0, 0, 0, 1, 1, 2], [0], [0]>} : vector<1x8x8xbf16>, vector<1x8x8xbf16>, vector<1x8x8xf32> -> vector<1x8x8xf32>
    "tpu.trace_stop"() : () -> ()
    %67 = vector.shape_cast %66 : vector<1x8x8xf32> to vector<8x8xf32>
    %c0_22 = arith.constant 0 : index
    %c8 = arith.constant 8 : index
    %68 = vector.load %arg20[%c0_22, %c8] : memref<8x32xf32, #tpu.memory_space<vmem>>, vector<8x8xf32>
    tpu.vector_store %arg20[%c0_22, %c8], %67 {strides = array<i32>} : memref<8x32xf32, #tpu.memory_space<vmem>>, vector<8x8xf32>,
    %69 = vector.extract_strided_slice %12 {offsets = [0, 16], sizes = [8, 8], strides = [1, 1]} : vector<8x96xf32> to vector<8x8xf32>
    %cst_23 = arith.constant 0.353553385 : f32
    %70 = vector.broadcast %cst_23 : f32 to vector<8x8xf32>
    %71 = arith.mulf %69, %70 : vector<8x8xf32>
    %72 = vector.extract_strided_slice %12 {offsets = [0, 48], sizes = [8, 8], strides = [1, 1]} : vector<8x96xf32> to vector<8x8xf32>
    %73 = vector.extract_strided_slice %12 {offsets = [0, 80], sizes = [8, 8], strides = [1, 1]} : vector<8x96xf32> to vector<8x8xf32>
    %74 = vector.shape_cast %71 : vector<8x8xf32> to vector<1x8x8xf32>
    %75 = arith.truncf %74 : vector<1x8x8xf32> to vector<1x8x8xbf16>
    %76 = vector.shape_cast %72 : vector<8x8xf32> to vector<1x8x8xf32>
    %77 = arith.truncf %76 : vector<1x8x8xf32> to vector<1x8x8xbf16>
    %78 = vector.shape_cast %73 : vector<8x8xf32> to vector<1x8x8xf32>
    %79 = arith.truncf %78 : vector<1x8x8xf32> to vector<1x8x8xbf16>
    "tpu.trace_start"() <{level = 10 : i32, message = "bqd,bkd->bqk"}> : () -> ()
    %cst_24 = arith.constant dense<0.000000e+00> : vector<1x8x8xf32>
    %80 = tpu.matmul %75, %77, %cst_24 {dimension_numbers = #tpu.dot_dimension_numbers<[2], [2], [1], [1], [0, 0, 0, 1, 1, 1], [0], [0]>} : vector<1x8x8xbf16>, vector<1x8x8xbf16>, vector<1x8x8xf32> -> vector<1x8x8xf32>
    "tpu.trace_stop"() : () -> ()
    %81 = vector.shape_cast %5 : vector<8x8xf32> to vector<1x8x8xf32>
    %82 = arith.addf %80, %81 : vector<1x8x8xf32>
    %cst_25 = arith.constant dense<0xFF800000> : vector<1x8xf32>
    %83 = vector.multi_reduction <maximumf>, %82, %cst_25 [2] : vector<1x8x8xf32> to vector<1x8xf32>
    %84 = vector.shape_cast %83 : vector<1x8xf32> to vector<1x8x1xf32>
    %85 = vector.broadcast %84 : vector<1x8x1xf32> to vector<1x8x8xf32>
    %86 = arith.subf %82, %85 : vector<1x8x8xf32>
    %87 = math.exp %86 : vector<1x8x8xf32>
    %cst_26 = arith.constant dense<0.000000e+00> : vector<1x8xf32>
    %88 = vector.multi_reduction <add>, %87, %cst_26 [2] : vector<1x8x8xf32> to vector<1x8xf32>
    %89 = vector.shape_cast %88 : vector<1x8xf32> to vector<1x8x1xf32>
    %90 = tpu.reciprocal %89 {approx = true} : vector<1x8x1xf32> -> vector<1x8x1xf32>
    %91 = vector.broadcast %90 : vector<1x8x1xf32> to vector<1x8x8xf32>
    %92 = arith.mulf %87, %91 : vector<1x8x8xf32>
    %93 = arith.truncf %92 : vector<1x8x8xf32> to vector<1x8x8xbf16>
    "tpu.trace_start"() <{level = 10 : i32, message = "bqk,bkd->bqd"}> : () -> ()
    %cst_27 = arith.constant dense<0.000000e+00> : vector<1x8x8xf32>
    %94 = tpu.matmul %93, %79, %cst_27 {dimension_numbers = #tpu.dot_dimension_numbers<[2], [1], [1], [2], [0, 0, 0, 1, 1, 2], [0], [0]>} : vector<1x8x8xbf16>, vector<1x8x8xbf16>, vector<1x8x8xf32> -> vector<1x8x8xf32>
    "tpu.trace_stop"() : () -> ()
    %95 = vector.shape_cast %94 : vector<1x8x8xf32> to vector<8x8xf32>
    %c0_28 = arith.constant 0 : index
    %c16 = arith.constant 16 : index
    %96 = vector.load %arg20[%c0_28, %c16] : memref<8x32xf32, #tpu.memory_space<vmem>>, vector<8x8xf32>
    tpu.vector_store %arg20[%c0_28, %c16], %95 {strides = array<i32>} : memref<8x32xf32, #tpu.memory_space<vmem>>, vector<8x8xf32>,
    %97 = vector.extract_strided_slice %12 {offsets = [0, 24], sizes = [8, 8], strides = [1, 1]} : vector<8x96xf32> to vector<8x8xf32>
    %cst_29 = arith.constant 0.353553385 : f32
    %98 = vector.broadcast %cst_29 : f32 to vector<8x8xf32>
    %99 = arith.mulf %97, %98 : vector<8x8xf32>
    %100 = vector.extract_strided_slice %12 {offsets = [0, 56], sizes = [8, 8], strides = [1, 1]} : vector<8x96xf32> to vector<8x8xf32>
    %101 = vector.extract_strided_slice %12 {offsets = [0, 88], sizes = [8, 8], strides = [1, 1]} : vector<8x96xf32> to vector<8x8xf32>
    %102 = vector.shape_cast %99 : vector<8x8xf32> to vector<1x8x8xf32>
    %103 = arith.truncf %102 : vector<1x8x8xf32> to vector<1x8x8xbf16>
    %104 = vector.shape_cast %100 : vector<8x8xf32> to vector<1x8x8xf32>
    %105 = arith.truncf %104 : vector<1x8x8xf32> to vector<1x8x8xbf16>
    %106 = vector.shape_cast %101 : vector<8x8xf32> to vector<1x8x8xf32>
    %107 = arith.truncf %106 : vector<1x8x8xf32> to vector<1x8x8xbf16>
    "tpu.trace_start"() <{level = 10 : i32, message = "bqd,bkd->bqk"}> : () -> ()
    %cst_30 = arith.constant dense<0.000000e+00> : vector<1x8x8xf32>
    %108 = tpu.matmul %103, %105, %cst_30 {dimension_numbers = #tpu.dot_dimension_numbers<[2], [2], [1], [1], [0, 0, 0, 1, 1, 1], [0], [0]>} : vector<1x8x8xbf16>, vector<1x8x8xbf16>, vector<1x8x8xf32> -> vector<1x8x8xf32>
    "tpu.trace_stop"() : () -> ()
    %109 = vector.shape_cast %5 : vector<8x8xf32> to vector<1x8x8xf32>
    %110 = arith.addf %108, %109 : vector<1x8x8xf32>
    %cst_31 = arith.constant dense<0xFF800000> : vector<1x8xf32>
    %111 = vector.multi_reduction <maximumf>, %110, %cst_31 [2] : vector<1x8x8xf32> to vector<1x8xf32>
    %112 = vector.shape_cast %111 : vector<1x8xf32> to vector<1x8x1xf32>
    %113 = vector.broadcast %112 : vector<1x8x1xf32> to vector<1x8x8xf32>
    %114 = arith.subf %110, %113 : vector<1x8x8xf32>
    %115 = math.exp %114 : vector<1x8x8xf32>
    %cst_32 = arith.constant dense<0.000000e+00> : vector<1x8xf32>
    %116 = vector.multi_reduction <add>, %115, %cst_32 [2] : vector<1x8x8xf32> to vector<1x8xf32>
    %117 = vector.shape_cast %116 : vector<1x8xf32> to vector<1x8x1xf32>
    %118 = tpu.reciprocal %117 {approx = true} : vector<1x8x1xf32> -> vector<1x8x1xf32>
    %119 = vector.broadcast %118 : vector<1x8x1xf32> to vector<1x8x8xf32>
    %120 = arith.mulf %115, %119 : vector<1x8x8xf32>
    %121 = arith.truncf %120 : vector<1x8x8xf32> to vector<1x8x8xbf16>
    "tpu.trace_start"() <{level = 10 : i32, message = "bqk,bkd->bqd"}> : () -> ()
    %cst_33 = arith.constant dense<0.000000e+00> : vector<1x8x8xf32>
    %122 = tpu.matmul %121, %107, %cst_33 {dimension_numbers = #tpu.dot_dimension_numbers<[2], [1], [1], [2], [0, 0, 0, 1, 1, 2], [0], [0]>} : vector<1x8x8xbf16>, vector<1x8x8xbf16>, vector<1x8x8xf32> -> vector<1x8x8xf32>
    "tpu.trace_stop"() : () -> ()
    %123 = vector.shape_cast %122 : vector<1x8x8xf32> to vector<8x8xf32>
    %c0_34 = arith.constant 0 : index
    %c24 = arith.constant 24 : index
    %124 = vector.load %arg20[%c0_34, %c24] : memref<8x32xf32, #tpu.memory_space<vmem>>, vector<8x8xf32>
    tpu.vector_store %arg20[%c0_34, %c24], %123 {strides = array<i32>} : memref<8x32xf32, #tpu.memory_space<vmem>>, vector<8x8xf32>,
    %c0_35 = arith.constant 0 : index
    %c0_36 = arith.constant 0 : index
    %125 = vector.load %arg20[%c0_35, %c0_36] : memref<8x32xf32, #tpu.memory_space<vmem>>, vector<8x32xf32>
    %126 = arith.truncf %125 : vector<8x32xf32> to vector<8x32xbf16>
    %c0_37 = arith.constant 0 : index
    %c0_38 = arith.constant 0 : index
    %c0_39 = arith.constant 0 : index
    %127 = vector.load %arg6[%c0_37, %c0_38, %c0_39] : memref<1x32x32xbf16, #tpu.memory_space<vmem>>, vector<1x32x32xbf16>
    %128 = vector.shape_cast %127 : vector<1x32x32xbf16> to vector<32x32xbf16>
    %cst_40 = arith.constant dense<0.000000e+00> : vector<8x32xf32>
    %129 = tpu.matmul %126, %128, %cst_40 {dimension_numbers = #tpu.dot_dimension_numbers<[1], [0], [0], [1], [0, 0, 1, 1], [], []>} : vector<8x32xbf16>, vector<32x32xbf16>, vector<8x32xf32> -> vector<8x32xf32>
    %c0_41 = arith.constant 0 : index
    %c0_42 = arith.constant 0 : index
    %c0_43 = arith.constant 0 : index
    %130 = vector.load %arg7[%c0_41, %c0_42, %c0_43] : memref<1x1x32xf32, #tpu.memory_space<vmem>>, vector<1x1x32xf32>
    %131 = vector.shape_cast %130 : vector<1x1x32xf32> to vector<1x32xf32>
    %132 = vector.broadcast %131 : vector<1x32xf32> to vector<8x32xf32>
    %133 = arith.addf %129, %132 : vector<8x32xf32>
    %134 = arith.addf %3, %133 : vector<8x32xf32>
    %c0_44 = arith.constant 0 : index
    %c0_45 = arith.constant 0 : index
    %c0_46 = arith.constant 0 : index
    %135 = vector.load %arg8[%c0_44, %c0_45, %c0_46] : memref<1x1x32xf32, #tpu.memory_space<vmem>>, vector<1x1x32xf32>
    %136 = vector.shape_cast %135 : vector<1x1x32xf32> to vector<1x32xf32>
    %c0_47 = arith.constant 0 : index
    %c0_48 = arith.constant 0 : index
    %c0_49 = arith.constant 0 : index
    %137 = vector.load %arg9[%c0_47, %c0_48, %c0_49] : memref<1x1x32xf32, #tpu.memory_space<vmem>>, vector<1x1x32xf32>
    %138 = vector.shape_cast %137 : vector<1x1x32xf32> to vector<1x32xf32>
    %cst_50 = arith.constant dense<0.000000e+00> : vector<8xf32>
    %139 = vector.multi_reduction <add>, %134, %cst_50 [1] : vector<8x32xf32> to vector<8xf32>
    %140 = vector.shape_cast %139 : vector<8xf32> to vector<8x1xf32>
    %cst_51 = arith.constant 3.200000e+01 : f32
    %141 = vector.broadcast %cst_51 : f32 to vector<8x1xf32>
    %142 = arith.divf %140, %141 : vector<8x1xf32>
    %143 = vector.broadcast %142 : vector<8x1xf32> to vector<8x32xf32>
    %144 = arith.subf %134, %143 : vector<8x32xf32>
    %145 = arith.mulf %144, %144 : vector<8x32xf32>
    %cst_52 = arith.constant dense<0.000000e+00> : vector<8xf32>
    %146 = vector.multi_reduction <add>, %145, %cst_52 [1] : vector<8x32xf32> to vector<8xf32>
    %147 = vector.shape_cast %146 : vector<8xf32> to vector<8x1xf32>
    %cst_53 = arith.constant 3.200000e+01 : f32
    %148 = vector.broadcast %cst_53 : f32 to vector<8x1xf32>
    %149 = arith.divf %147, %148 : vector<8x1xf32>
    %cst_54 = arith.constant 9.99999974E-6 : f32
    %150 = vector.broadcast %cst_54 : f32 to vector<8x1xf32>
    %151 = arith.addf %149, %150 : vector<8x1xf32>
    %152 = math.rsqrt %151 : vector<8x1xf32>
    %153 = vector.broadcast %152 : vector<8x1xf32> to vector<8x32xf32>
    %154 = arith.mulf %144, %153 : vector<8x32xf32>
    %155 = vector.broadcast %136 : vector<1x32xf32> to vector<8x32xf32>
    %156 = arith.mulf %154, %155 : vector<8x32xf32>
    %157 = vector.broadcast %138 : vector<1x32xf32> to vector<8x32xf32>
    %158 = arith.addf %156, %157 : vector<8x32xf32>
    %159 = arith.truncf %158 : vector<8x32xf32> to vector<8x32xbf16>
    %c0_55 = arith.constant 0 : index
    %c0_56 = arith.constant 0 : index
    %c0_57 = arith.constant 0 : index
    %160 = vector.load %arg10[%c0_55, %c0_56, %c0_57] : memref<1x32x64xbf16, #tpu.memory_space<vmem>>, vector<1x32x64xbf16>
    %161 = vector.shape_cast %160 : vector<1x32x64xbf16> to vector<32x64xbf16>
    %cst_58 = arith.constant dense<0.000000e+00> : vector<8x64xf32>
    %162 = tpu.matmul %159, %161, %cst_58 {dimension_numbers = #tpu.dot_dimension_numbers<[1], [0], [0], [1], [0, 0, 1, 1], [], []>} : vector<8x32xbf16>, vector<32x64xbf16>, vector<8x64xf32> -> vector<8x64xf32>
    %c0_59 = arith.constant 0 : index
    %c0_60 = arith.constant 0 : index
    %c0_61 = arith.constant 0 : index
    %163 = vector.load %arg11[%c0_59, %c0_60, %c0_61] : memref<1x1x64xf32, #tpu.memory_space<vmem>>, vector<1x1x64xf32>
    %164 = vector.shape_cast %163 : vector<1x1x64xf32> to vector<1x64xf32>
    %165 = vector.broadcast %164 : vector<1x64xf32> to vector<8x64xf32>
    %166 = arith.addf %162, %165 : vector<8x64xf32>
    %cst_62 = arith.constant 5.000000e-01 : f32
    %167 = vector.broadcast %cst_62 : f32 to vector<8x64xf32>
    %168 = arith.mulf %167, %166 : vector<8x64xf32>
    %cst_63 = arith.constant 0.707106769 : f32
    %169 = vector.broadcast %cst_63 : f32 to vector<8x64xf32>
    %170 = arith.mulf %166, %169 : vector<8x64xf32>
    %171 = math.absf %170 : vector<8x64xf32>
    %cst_64 = arith.constant 0.327591091 : f32
    %172 = vector.broadcast %cst_64 : f32 to vector<8x64xf32>
    %173 = arith.mulf %172, %171 : vector<8x64xf32>
    %cst_65 = arith.constant 1.000000e+00 : f32
    %174 = vector.broadcast %cst_65 : f32 to vector<8x64xf32>
    %175 = arith.addf %174, %173 : vector<8x64xf32>
    %cst_66 = arith.constant 1.000000e+00 : f32
    %176 = vector.broadcast %cst_66 : f32 to vector<8x64xf32>
    %177 = arith.divf %176, %175 : vector<8x64xf32>
    %cst_67 = arith.constant 1.06140542 : f32
    %178 = vector.broadcast %cst_67 : f32 to vector<8x64xf32>
    %179 = arith.mulf %178, %177 : vector<8x64xf32>
    %cst_68 = arith.constant -1.45315206 : f32
    %180 = vector.broadcast %cst_68 : f32 to vector<8x64xf32>
    %181 = arith.addf %179, %180 : vector<8x64xf32>
    %182 = arith.mulf %181, %177 : vector<8x64xf32>
    %cst_69 = arith.constant 1.42141378 : f32
    %183 = vector.broadcast %cst_69 : f32 to vector<8x64xf32>
    %184 = arith.addf %182, %183 : vector<8x64xf32>
    %185 = arith.mulf %184, %177 : vector<8x64xf32>
    %cst_70 = arith.constant -0.284496725 : f32
    %186 = vector.broadcast %cst_70 : f32 to vector<8x64xf32>
    %187 = arith.addf %185, %186 : vector<8x64xf32>
    %188 = arith.mulf %187, %177 : vector<8x64xf32>
    %cst_71 = arith.constant 0.254829586 : f32
    %189 = vector.broadcast %cst_71 : f32 to vector<8x64xf32>
    %190 = arith.addf %188, %189 : vector<8x64xf32>
    %191 = arith.mulf %190, %177 : vector<8x64xf32>
    %cst_72 = arith.constant 0.000000e+00 : f32
    %192 = vector.broadcast %cst_72 : f32 to vector<8x64xf32>
    %193 = arith.subf %192, %171 : vector<8x64xf32>
    %194 = arith.mulf %193, %171 : vector<8x64xf32>
    %195 = math.exp %194 : vector<8x64xf32>
    %196 = arith.mulf %191, %195 : vector<8x64xf32>
    %cst_73 = arith.constant 1.000000e+00 : f32
    %197 = vector.broadcast %cst_73 : f32 to vector<8x64xf32>
    %198 = arith.subf %197, %196 : vector<8x64xf32>
    %cst_74 = arith.constant 0.000000e+00 : f32
    %199 = vector.broadcast %cst_74 : f32 to vector<8x64xf32>
    %200 = arith.cmpf oge, %170, %199 : vector<8x64xf32>
    %cst_75 = arith.constant 0.000000e+00 : f32
    %201 = vector.broadcast %cst_75 : f32 to vector<8x64xf32>
    %202 = arith.subf %201, %198 : vector<8x64xf32>
    %203 = arith.select %200, %198, %202 : vector<8x64xi1>, vector<8x64xf32>
    %cst_76 = arith.constant 1.000000e+00 : f32
    %204 = vector.broadcast %cst_76 : f32 to vector<8x64xf32>
    %205 = arith.addf %204, %203 : vector<8x64xf32>
    %206 = arith.mulf %168, %205 : vector<8x64xf32>
    %207 = arith.truncf %206 : vector<8x64xf32> to vector<8x64xbf16>
    %c0_77 = arith.constant 0 : index
    %c0_78 = arith.constant 0 : index
    %c0_79 = arith.constant 0 : index
    %208 = vector.load %arg12[%c0_77, %c0_78, %c0_79] : memref<1x64x32xbf16, #tpu.memory_space<vmem>>, vector<1x64x32xbf16>
    %209 = vector.shape_cast %208 : vector<1x64x32xbf16> to vector<64x32xbf16>
    %cst_80 = arith.constant dense<0.000000e+00> : vector<8x32xf32>
    %210 = tpu.matmul %207, %209, %cst_80 {dimension_numbers = #tpu.dot_dimension_numbers<[1], [0], [0], [1], [0, 0, 1, 1], [], []>} : vector<8x64xbf16>, vector<64x32xbf16>, vector<8x32xf32> -> vector<8x32xf32>
    %c0_81 = arith.constant 0 : index
    %c0_82 = arith.constant 0 : index
    %c0_83 = arith.constant 0 : index
    %211 = vector.load %arg13[%c0_81, %c0_82, %c0_83] : memref<1x1x32xf32, #tpu.memory_space<vmem>>, vector<1x1x32xf32>
    %212 = vector.shape_cast %211 : vector<1x1x32xf32> to vector<1x32xf32>
    %213 = vector.broadcast %212 : vector<1x32xf32> to vector<8x32xf32>
    %214 = arith.addf %210, %213 : vector<8x32xf32>
    %215 = arith.addf %158, %214 : vector<8x32xf32>
    %c0_84 = arith.constant 0 : index
    %c0_85 = arith.constant 0 : index
    %c0_86 = arith.constant 0 : index
    %216 = vector.load %arg14[%c0_84, %c0_85, %c0_86] : memref<1x1x32xf32, #tpu.memory_space<vmem>>, vector<1x1x32xf32>
    %217 = vector.shape_cast %216 : vector<1x1x32xf32> to vector<1x32xf32>
    %c0_87 = arith.constant 0 : index
    %c0_88 = arith.constant 0 : index
    %c0_89 = arith.constant 0 : index
    %218 = vector.load %arg15[%c0_87, %c0_88, %c0_89] : memref<1x1x32xf32, #tpu.memory_space<vmem>>, vector<1x1x32xf32>
    %219 = vector.shape_cast %218 : vector<1x1x32xf32> to vector<1x32xf32>
    %cst_90 = arith.constant dense<0.000000e+00> : vector<8xf32>
    %220 = vector.multi_reduction <add>, %215, %cst_90 [1] : vector<8x32xf32> to vector<8xf32>
    %221 = vector.shape_cast %220 : vector<8xf32> to vector<8x1xf32>
    %cst_91 = arith.constant 3.200000e+01 : f32
    %222 = vector.broadcast %cst_91 : f32 to vector<8x1xf32>
    %223 = arith.divf %221, %222 : vector<8x1xf32>
    %224 = vector.broadcast %223 : vector<8x1xf32> to vector<8x32xf32>
    %225 = arith.subf %215, %224 : vector<8x32xf32>
    %226 = arith.mulf %225, %225 : vector<8x32xf32>
    %cst_92 = arith.constant dense<0.000000e+00> : vector<8xf32>
    %227 = vector.multi_reduction <add>, %226, %cst_92 [1] : vector<8x32xf32> to vector<8xf32>
    %228 = vector.shape_cast %227 : vector<8xf32> to vector<8x1xf32>
    %cst_93 = arith.constant 3.200000e+01 : f32
    %229 = vector.broadcast %cst_93 : f32 to vector<8x1xf32>
    %230 = arith.divf %228, %229 : vector<8x1xf32>
    %cst_94 = arith.constant 9.99999974E-6 : f32
    %231 = vector.broadcast %cst_94 : f32 to vector<8x1xf32>
    %232 = arith.addf %230, %231 : vector<8x1xf32>
    %233 = math.rsqrt %232 : vector<8x1xf32>
    %234 = vector.broadcast %233 : vector<8x1xf32> to vector<8x32xf32>
    %235 = arith.mulf %225, %234 : vector<8x32xf32>
    %236 = vector.broadcast %217 : vector<1x32xf32> to vector<8x32xf32>
    %237 = arith.mulf %235, %236 : vector<8x32xf32>
    %238 = vector.broadcast %219 : vector<1x32xf32> to vector<8x32xf32>
    %239 = arith.addf %237, %238 : vector<8x32xf32>
    %c0_95 = arith.constant 0 : index
    %c0_96 = arith.constant 0 : index
    %240 = vector.load %arg19[%c0_95, %c0_96] : memref<8x32xf32, #tpu.memory_space<vmem>>, vector<8x32xf32>
    tpu.vector_store %arg19[%c0_95, %c0_96], %239 {strides = array<i32>} : memref<8x32xf32, #tpu.memory_space<vmem>>, vector<8x32xf32>,
    %c1_i32 = arith.constant 1 : i32
    %241 = arith.cmpi eq, %arg1, %c1_i32 : i32
    %242 = arith.extui %241 : i1 to i32
    %c0_i32_97 = arith.constant 0 : i32
    %243 = arith.cmpi ne, %242, %c0_i32_97 : i32
    scf.if %243 {
      %c0_98 = arith.constant 0 : index
      %c0_99 = arith.constant 0 : index
      %244 = vector.load %arg16[%c0_98, %c0_99] : memref<1x32xf32, #tpu.memory_space<vmem>>, vector<1x32xf32>
      %c0_100 = arith.constant 0 : index
      %c0_101 = arith.constant 0 : index
      %245 = vector.load %arg17[%c0_100, %c0_101] : memref<1x32xf32, #tpu.memory_space<vmem>>, vector<1x32xf32>
      %cst_102 = arith.constant dense<0.000000e+00> : vector<8xf32>
      %246 = vector.multi_reduction <add>, %239, %cst_102 [1] : vector<8x32xf32> to vector<8xf32>
      %247 = vector.shape_cast %246 : vector<8xf32> to vector<8x1xf32>
      %cst_103 = arith.constant 3.200000e+01 : f32
      %248 = vector.broadcast %cst_103 : f32 to vector<8x1xf32>
      %249 = arith.divf %247, %248 : vector<8x1xf32>
      %250 = vector.broadcast %249 : vector<8x1xf32> to vector<8x32xf32>
      %251 = arith.subf %239, %250 : vector<8x32xf32>
      %252 = arith.mulf %251, %251 : vector<8x32xf32>
      %cst_104 = arith.constant dense<0.000000e+00> : vector<8xf32>
      %253 = vector.multi_reduction <add>, %252, %cst_104 [1] : vector<8x32xf32> to vector<8xf32>
      %254 = vector.shape_cast %253 : vector<8xf32> to vector<8x1xf32>
      %cst_105 = arith.constant 3.200000e+01 : f32
      %255 = vector.broadcast %cst_105 : f32 to vector<8x1xf32>
      %256 = arith.divf %254, %255 : vector<8x1xf32>
      %cst_106 = arith.constant 9.99999974E-6 : f32
      %257 = vector.broadcast %cst_106 : f32 to vector<8x1xf32>
      %258 = arith.addf %256, %257 : vector<8x1xf32>
      %259 = math.rsqrt %258 : vector<8x1xf32>
      %260 = vector.broadcast %259 : vector<8x1xf32> to vector<8x32xf32>
      %261 = arith.mulf %251, %260 : vector<8x32xf32>
      %262 = vector.broadcast %244 : vector<1x32xf32> to vector<8x32xf32>
      %263 = arith.mulf %261, %262 : vector<8x32xf32>
      %264 = vector.broadcast %245 : vector<1x32xf32> to vector<8x32xf32>
      %265 = arith.addf %263, %264 : vector<8x32xf32>
      %266 = vector.shape_cast %265 : vector<8x32xf32> to vector<1x8x32xf32>
      %267 = arith.truncf %266 : vector<1x8x32xf32> to vector<1x8x32xbf16>
      %c0_107 = arith.constant 0 : index
      %c0_108 = arith.constant 0 : index
      %c0_109 = arith.constant 0 : index
      %268 = vector.load %arg18[%c0_107, %c0_108, %c0_109] : memref<1x8x32xbf16, #tpu.memory_space<vmem>>, vector<1x8x32xbf16>
      tpu.vector_store %arg18[%c0_107, %c0_108, %c0_109], %267 {strides = array<i32>} : memref<1x8x32xbf16, #tpu.memory_space<vmem>>, vector<1x8x32xbf16>,
    } else {
    }
    return
  }
  func.func @transform_0(%arg0: i32, %arg1: i32) -> (i32, i32, i32) {
    %c0_i32 = arith.constant 0 : i32
    %c0_i32_0 = arith.constant 0 : i32
    %c0_i32_1 = arith.constant 0 : i32
    return %arg0, %c0_i32, %c0_i32_0 : i32, i32, i32
  }
  func.func @transform_1(%arg0: i32, %arg1: i32) -> (i32, i32) {
    %c0_i32 = arith.constant 0 : i32
    %c0_i32_0 = arith.constant 0 : i32
    %c0_i32_1 = arith.constant 0 : i32
    return %c0_i32, %c0_i32_0 : i32, i32
  }
  func.func @transform_2(%arg0: i32, %arg1: i32) -> (i32, i32, i32) {
    %c0_i32 = arith.constant 0 : i32
    %c0_i32_0 = arith.constant 0 : i32
    %c0_i32_1 = arith.constant 0 : i32
    return %arg1, %c0_i32, %c0_i32_0 : i32, i32, i32
  }
  func.func @transform_3(%arg0: i32, %arg1: i32) -> (i32, i32, i32) {
    %c0_i32 = arith.constant 0 : i32
    %c0_i32_0 = arith.constant 0 : i32
    %c0_i32_1 = arith.constant 0 : i32
    return %arg1, %c0_i32, %c0_i32_0 : i32, i32, i32
  }
  func.func @transform_4(%arg0: i32, %arg1: i32) -> (i32, i32, i32) {
    %c0_i32 = arith.constant 0 : i32
    %c0_i32_0 = arith.constant 0 : i32
    %c0_i32_1 = arith.constant 0 : i32
    return %arg1, %c0_i32, %c0_i32_0 : i32, i32, i32
  }
  func.func @transform_5(%arg0: i32, %arg1: i32) -> (i32, i32, i32) {
    %c0_i32 = arith.constant 0 : i32
    %c0_i32_0 = arith.constant 0 : i32
    %c0_i32_1 = arith.constant 0 : i32
    return %arg1, %c0_i32, %c0_i32_0 : i32, i32, i32
  }
  func.func @transform_6(%arg0: i32, %arg1: i32) -> (i32, i32, i32) {
    %c0_i32 = arith.constant 0 : i32
    %c0_i32_0 = arith.constant 0 : i32
    %c0_i32_1 = arith.constant 0 : i32
    return %arg1, %c0_i32, %c0_i32_0 : i32, i32, i32
  }
  func.func @transform_7(%arg0: i32, %arg1: i32) -> (i32, i32, i32) {
    %c0_i32 = arith.constant 0 : i32
    %c0_i32_0 = arith.constant 0 : i32
    %c0_i32_1 = arith.constant 0 : i32
    return %arg1, %c0_i32, %c0_i32_0 : i32, i32, i32
  }
  func.func @transform_8(%arg0: i32, %arg1: i32) -> (i32, i32, i32) {
    %c0_i32 = arith.constant 0 : i32
    %c0_i32_0 = arith.constant 0 : i32
    %c0_i32_1 = arith.constant 0 : i32
    return %arg1, %c0_i32, %c0_i32_0 : i32, i32, i32
  }
  func.func @transform_9(%arg0: i32, %arg1: i32) -> (i32, i32, i32) {
    %c0_i32 = arith.constant 0 : i32
    %c0_i32_0 = arith.constant 0 : i32
    %c0_i32_1 = arith.constant 0 : i32
    return %arg1, %c0_i32, %c0_i32_0 : i32, i32, i32
  }
  func.func @transform_10(%arg0: i32, %arg1: i32) -> (i32, i32, i32) {
    %c0_i32 = arith.constant 0 : i32
    %c0_i32_0 = arith.constant 0 : i32
    %c0_i32_1 = arith.constant 0 : i32
    return %arg1, %c0_i32, %c0_i32_0 : i32, i32, i32
  }
  func.func @transform_11(%arg0: i32, %arg1: i32) -> (i32, i32, i32) {
    %c0_i32 = arith.constant 0 : i32
    %c0_i32_0 = arith.constant 0 : i32
    %c0_i32_1 = arith.constant 0 : i32
    return %arg1, %c0_i32, %c0_i32_0 : i32, i32, i32
  }
  func.func @transform_12(%arg0: i32, %arg1: i32) -> (i32, i32, i32) {
    %c0_i32 = arith.constant 0 : i32
    %c0_i32_0 = arith.constant 0 : i32
    %c0_i32_1 = arith.constant 0 : i32
    return %arg1, %c0_i32, %c0_i32_0 : i32, i32, i32
  }
  func.func @transform_13(%arg0: i32, %arg1: i32) -> (i32, i32, i32) {
    %c0_i32 = arith.constant 0 : i32
    %c0_i32_0 = arith.constant 0 : i32
    %c0_i32_1 = arith.constant 0 : i32
    return %arg1, %c0_i32, %c0_i32_0 : i32, i32, i32
  }
  func.func @transform_14(%arg0: i32, %arg1: i32) -> (i32, i32) {
    %c0_i32 = arith.constant 0 : i32
    %c0_i32_0 = arith.constant 0 : i32
    %c0_i32_1 = arith.constant 0 : i32
    return %c0_i32, %c0_i32_0 : i32, i32
  }
  func.func @transform_15(%arg0: i32, %arg1: i32) -> (i32, i32) {
    %c0_i32 = arith.constant 0 : i32
    %c0_i32_0 = arith.constant 0 : i32
    %c0_i32_1 = arith.constant 0 : i32
    return %c0_i32, %c0_i32_0 : i32, i32
  }
  func.func @transform_16(%arg0: i32, %arg1: i32) -> (i32, i32, i32) {
    %c0_i32 = arith.constant 0 : i32
    %c0_i32_0 = arith.constant 0 : i32
    %c0_i32_1 = arith.constant 0 : i32
    return %arg0, %c0_i32, %c0_i32_0 : i32, i32, i32
  }
}

</mosaic_0001>

<bundles_post_ra>
// kernel: tpu_custom_call.1
= control target key start
LH: loop header
LB: loop body
LE: loop exit
PB: predicated region body
PF: predicated region fallthrough
CT: control target
= control target key end

     0   :  { %s2719_s0 = inlined_call_operand.hbm [shape: bf16[2,8,32], index: 0, kind: input, shape index: {}]   ;;  %s2720_s1 = inlined_call_operand.hbm [shape: f32[8,8], index: 1, kind: input, shape index: {}]   ;;  %s2721_s2 = inlined_call_operand.vmem [shape: bf16[2,32,96], index: 2, kind: input, shape index: {}]   ;;  %s2722_s3 = inlined_call_operand.hbm [shape: f32[2,1,96], index: 3, kind: input, shape index: {}]   ;;  %s2723_s4 = inlined_call_operand.vmem [shape: bf16[2,32,32], index: 4, kind: input, shape index: {}]   ;;  %s2724_s5 = inlined_call_operand.vmem [shape: f32[2,1,32], index: 5, kind: input, shape index: {}]   ;;  %s2725_s6 = inlined_call_operand.vmem [shape: f32[2,1,32], index: 6, kind: input, shape index: {}]   ;;  %s2726_s7 = inlined_call_operand.hbm [shape: f32[2,1,32], index: 7, kind: input, shape index: {}]   ;;  %s2727_s8 = inlined_call_operand.vmem [shape: bf16[2,32,64], index: 8, kind: input, shape index: {}]   ;;  %s2728_s9 = inlined_call_operand.vmem [shape: f32[2,1,64], index: 9, kind: input, shape index: {}]   ;;  %s2729_s10 = inlined_call_operand.vmem [shape: bf16[2,64,32], index: 10, kind: input, shape index: {}]   ;;  %s2730_s11 = inlined_call_operand.vmem [shape: f32[2,1,32], index: 11, kind: input, shape index: {}]   ;;  %s2731_s12 = inlined_call_operand.vmem [shape: f32[2,1,32], index: 12, kind: input, shape index: {}]   ;;  %s2732_s13 = inlined_call_operand.hbm [shape: f32[2,1,32], index: 13, kind: input, shape index: {}]   ;;  %s2733_s14 = inlined_call_operand.vmem [shape: f32[1,32], index: 14, kind: input, shape index: {}]   ;;  %s2734_s15 = inlined_call_operand.vmem [shape: f32[1,32], index: 15, kind: input, shape index: {}]   ;;  %s2735_s16 = inlined_call_operand.hbm [shape: bf16[2,8,32], index: 16, kind: output, shape index: {}]  }
   0x1   :  { %2749 = sst [smem:[#allocation30_spill]] %s2719_s0 }
   0x2   :  { %2750 = sst [smem:[#allocation31_spill]] %s2720_s1 }
   0x3   :  { %2751 = sst [smem:[#allocation32_spill]] %s2721_s2 }
   0x4   :  { %2752 = sst [smem:[#allocation33_spill]] %s2722_s3 }
   0x5   :  { %2753 = sst [smem:[#allocation34_spill]] %s2723_s4 }
   0x6   :  { %2754 = sst [smem:[#allocation35_spill]] %s2725_s6 }
   0x7   :  { %2755 = sst [smem:[#allocation36_spill]] %s2726_s7 }
   0x8   :  { %2756 = sst [smem:[#allocation37_spill]] %s2727_s8 }
   0x9   :  { %2757 = sst [smem:[#allocation38_spill]] %s2728_s9 }
   0xa   :  { %2758 = sst [smem:[#allocation39_spill]] %s2729_s10 }
   0xb   :  { %2759 = sst [smem:[#allocation40_spill]] %s2730_s11 }
   0xc   :  { %2760 = sst [smem:[#allocation41_spill]] %s2731_s12 }
   0xd   :  { %2761 = sst [smem:[#allocation42_spill]] %s2732_s13 }
   0xe   :  { %2762 = sst [smem:[#allocation43_spill]] %s2733_s14 }
   0xf   :  { %2763 = sst [smem:[#allocation44_spill]] %s2734_s15 }
  0x10   :  { %2764 = sst [smem:[#allocation45_spill]] %s2735_s16 }
  0x11   :  { %21 = vsyncpa [#allocation5], 0 }
  0x12   :  { %23 = vsyncpa [#allocation5 + $0x1], 0 }
  0x13   :  { %24 = vsyncpa [#allocation8], 0 }
  0x14   :  { %25 = vsyncpa [#allocation6], 0 }
  0x15   :  { %27 = vsyncpa [#allocation6 + $0x1], 0  ;;  %s2298_s21 = smov 0   ;;  %s2300_s22 = smov 0  }
  0x16   :  { %s2302_s23 = smov 0   ;;  %s2304_s24 = smov 0  }
  0x17   :  { %s2306_s25 = smov 0   ;;  %s2308_s26 = smov 0  }
  0x18   :  { %s2310_s27 = smov 0   ;;  %s2312_s28 = smov 0  }
  0x19   :  { %s2314_s29 = smov 0   ;;  %s2316_s30 = smov 0  }
  0x1a   :  { %s2318_s0 = smov 0  }
  0x1b LB: > { %2765 = sst [smem:[#allocation17_spill]] %s2159_s22  ;;  %s1644_s17 = sadd.s32 4294967294, %s2195_s0   ;;  %s2195_s0 = sphi %s2318_s0, %s33_s0   ;;  %s2191_s30 = sphi %s2316_s30, %s2822_s30   ;;  %s2187_s29 = sphi %s2314_s29, %s2821_s29   ;;  %s2183_s28 = sphi %s2312_s28, %s2820_s28   ;;  %s2179_s27 = sphi %s2310_s27, %s2819_s27   ;;  %s2175_s26 = sphi %s2308_s26, %s2818_s26   ;;  %s2171_s25 = sphi %s2306_s25, %s2824_s25   ;;  %s2167_s24 = sphi %s2304_s24, %s2823_s24   ;;  %s2163_s23 = sphi %s2302_s23, %s2816_s23   ;;  %s2159_s22 = sphi %s2300_s22, %s2815_s22   ;;  %s2155_s21 = sphi %s2298_s21, %s2814_s21  }
  0x1c   : > { %2766 = sst [smem:[#allocation18_spill]] %s2163_s23  ;;  %s42_s18 = sadd.s32 1, %s2187_s29 }
  0x1d   : > { %2767 = sst [smem:[#allocation19_spill]] %s2167_s24  ;;  %p43_p0 = scmp.ge.s32.totalorder %s42_s18, 2 }
  0x1e   : > { %2768 = sst [smem:[#allocation20_spill]] %s2175_s26  ;;  %s45_s19 = sadd.s32 1, %s2191_s30 }
  0x1f   : > { %2769 = sst [smem:[#allocation21_spill]] %s2183_s28  ;;  %s52_s20 = sadd.s32 1, %s2175_s26 }
  0x20   : > { %2770 = sst [smem:[#allocation22_spill]] %s2187_s29  ;;  %p59_p1 = scmp.ne.s32.totalorder %s2175_s26, %s2171_s25 }
  0x21   : > { %2771 = sst [smem:[#allocation23_spill]] %s2191_s30  ;;  %s2826_s18 = smov (%p43_p0, %s42_s18), 0 }
  0x22   : > { %2772 = sst [smem:[#allocation24_spill]] %s2195_s0  ;;  %s2828_s19 = smov (!%p43_p0, %s45_s19), %s2191_s30 }
  0x23   : > { %2773 = sst [smem:[#allocation25_spill]] %s2826_s18  ;;  %p60_p2 = scmp.eq.s32.totalorder %s2195_s0, 0 }
  0x24   : > { %p65_p3 = scmp.ne.s32.totalorder %s2171_s25, %s2167_s24  ;;  %p47_p4 = scmp.ge.s32.totalorder %s2828_s19, 2 }
  0x25   : > { %s122_s16 = ssub.s32 %s2187_s29, %s2826_s18  ;;  %p2370_p5 = por %p60_p2, %p59_p1 }
  0x26   : > { %p123_p6 = scmp.eq.s32.totalorder %s122_s16, 0  ;;  %s2830_s19 = smov (%p47_p4, %s2828_s19), 0 }
  0x27   : > { %2775 = sst [smem:[#allocation26_spill]] %s2830_s19  ;;  %s125_s15 = sadd.s32 1, %s2163_s23 }
  0x28   : > { %p132_p7 = scmp.ne.s32.totalorder %s2163_s23, %s2159_s22  ;;  %s49_s14 = ssub.s32 %s2191_s30, %s2830_s19 }
  0x29   : > { %p470_p8 = scmp.eq.s32.totalorder %s1644_s17, 3  ;;  %p50_p9 = scmp.eq.s32.totalorder %s49_s14, 0 }
  0x2a   : > { %p2381_p10 = por %p132_p7, %p60_p2  ;;  %p1770_p12 = scmp.lt.s32.totalorder %s2195_s0, 4 }
  0x2b   : > { %s2386_s18 = scalar_select %p123_p6, %s2163_s23, %s125_s15  }
  0x2c   : > { %s2389_s11 = scalar_select %p50_p9, %s2175_s26, %s52_s20  }
  0x2d   : > { %2777 = sst [smem:[#allocation27_spill]] %s2386_s18  ;;  %p2394_p11 = por %p470_p8, %p65_p3 }
  0x2e   : > { %2778 = sst [smem:[#allocation28_spill]] %s2389_s11  ;;  %s508_s17 = sand.u32 1, %s2195_s0  }
  0x2f   : > { %s2779_s16 = scalar_select %p2394_p11, 1, 0 }
  0x30   : > { %s510_s14 = sand.u32 1, %s2175_s26   ;;  %s1649_s10 = sshll.u32 %s2191_s30, 2 }
  0x31   : > { %2780 = sst [smem:[#allocation29_spill]] %s2779_s16  ;;  %s1648_s19 = sshll.u32 %s510_s14, 2 }
  0x32   : > { %s2781_s6 = sld [smem:[#allocation30_spill]]  ;;  %s512_s18 = scalar_lea.vmem [#allocation4], %s1648_s19 }
  0x33   : > { %s520_s20 = sshll.u32 %s512_s18, 4  ;;  %p1753_p13 = pnand %p1770_p12, %p2370_p5  ;;  %s521_s20 = int_to_ptr.vmem [resolvable:$true] %s520_s20 }
  0x34   : > { %p2409_p0 = pnand %p1770_p12, %p2381_p10  ;;  %s2414_s14 = sand.u32 1, %s2163_s23  }
  0x35   : > { %s2783_s3 = sld [smem:[#allocation33_spill]]  ;;  %s538_s9 = scalar_lea.vmem [#allocation9], %s2414_s14 }
  0x36   : > { %s2784_s7 = sld [smem:[#allocation36_spill]]  ;;  %s575_s18 = scalar_lea.vmem [#allocation10], %s2414_s14 }
  0x37   : > { %s582_s19 = sshll.u32 %s575_s18, 4  ;;  %p138_p4 = scmp.ne.s32.totalorder %s2159_s22, %s2155_s21  ;;  %s583_s19 = int_to_ptr.vmem [resolvable:$true] %s582_s19 }
  0x38   : > { %s516_s4 = scalar_lea.hbm %s2781_s6, %s1649_s10  ;;  %s2420_s6 = scalar_lea.sflag [#allocation5], %s508_s17 }
  0x39   : > { %s518_s15 = sshll.u32 %s516_s4, 4  ;;  %s545_s10 = sshll.u32 %s538_s9, 4  ;;  %s519_s15 = int_to_ptr.hbm [resolvable:$true] %s518_s15  ;;  %s546_s10 = int_to_ptr.vmem [resolvable:$true] %s545_s10 }
  0x3a   : > { %1755 = dma.hbm_to_vmem [thread:$0]  (!%p1753_p13), %s519_s15, 64, %s521_s20, %s2420_s6  }
  0x3b   : > { %s541_s4 = scalar_lea.hbm %s2783_s3, %s2187_s29  ;;  %s2436_s17 = sadd.s32 4294967295, %s2195_s0  }
  0x3c   : > { %s543_s8 = sshll.u32 %s541_s4, 4  ;;  %s578_s30 = scalar_lea.hbm %s2784_s7, %s2187_s29  ;;  %s544_s8 = int_to_ptr.hbm [resolvable:$true] %s543_s8 }
  0x3d   : > { %1758 = dma.hbm_to_vmem [thread:$0]  (!%p2409_p0), %s544_s8, 16, %s546_s10, %s2420_s6  }
  0x3e   : > { %s580_s16 = sshll.u32 %s578_s30, 4  ;;  %p66_p2 = scmp.eq.s32.totalorder %s2436_s17, 0  ;;  %s581_s16 = int_to_ptr.hbm [resolvable:$true] %s580_s16 }
  0x3f   : > { %1761 = dma.hbm_to_vmem [thread:$0]  (!%p2409_p0), %s581_s16, 16, %s583_s19, %s2420_s6  }
  0x40   : > { %p464_p5 = scmp.eq.s32.totalorder %s2436_s17, 3  ;;  %p1645_p6 = scmp.ge.s32.totalorder %s2195_s0, 1 }
  0x41   : > { %p2448_p7 = por %p66_p2, %p65_p3  ;;  %p2454_p8 = por %p138_p4, %p66_p2 }
  0x42   : > { %p2461_p9 = por %p464_p5, %p59_p1  ;;  %p477_p10 = scmp.lt.s32.totalorder %s2195_s0, 5 }
  0x43   : > { %s2788_s1 = sld [smem:[#allocation31_spill]]  ;;  %s2197_s12 = smov [#allocation7]  }
  0x44   : > { %p2469_p3 = pnand %p1645_p6, %p477_p10  ;;  %s491_s28 = sshll.u32 %s2197_s12, 4  ;;  %s492_s28 = int_to_ptr.vmem [resolvable:$true] %s491_s28 }
  0x45   : > { %s2790_s13 = sld [smem:[#allocation42_spill]]  ;;  %s626_s21 = scalar_lea.vmem [#allocation11], %s2414_s14 }
  0x46   : > { %p1748_p12 = pneg %p2469_p3  ;;  %s633_s8 = sshll.u32 %s626_s21, 4  ;;  %s634_s8 = int_to_ptr.vmem [resolvable:$true] %s633_s8 }
  0x47   : > { %s644_s12 = sand.u32 (!%p2469_p3), 1, %s2436_s17   ;;  %s2741_s30 = sand.u32 (!%p2469_p3), 1, %s2171_s25  }
  0x48   : > { %p1749_p1 = pnand %p1748_p12, %p66_p2  ;;  %s2491_s18 = sshll.u32 (!%p2469_p3), %s2741_s30, 2 }
  0x49   : > { %s489_s9 = sshll.u32 %s2788_s1, 4  ;;  %642 = sbr.rel (%p2469_p3) target bundleno = 2337 (0x921), region = 84  ;;  %s490_s9 = int_to_ptr.hbm [resolvable:$true] %s489_s9 }
  0x4a   : > { %1751 = dma.hbm_to_vmem [thread:$0]  (!%p1749_p1), %s490_s9, 128, %s492_s28, [#allocation8]  }
  0x4b   : > { %s629_s19 = scalar_lea.hbm %s2790_s13, %s2187_s29  ;;  %s648_s14 = scalar_lea.vmem (!%p2469_p3), [#allocation4], %s2491_s18 }
  0x4c   : > { %s631_s16 = sshll.u32 %s629_s19, 4  ;;  %s645_s19 = scalar_lea.sflag (!%p2469_p3), [#allocation5], %s644_s12  ;;  %s632_s16 = int_to_ptr.hbm [resolvable:$true] %s631_s16 }
  0x4d   : > { %1764 = dma.hbm_to_vmem [thread:$0]  (!%p2409_p0), %s632_s16, 16, %s634_s8, %s2420_s6  }
  0x4e   : > { %2138 = dma.done.wait (%p2448_p7), %s645_s19, 64  }
  0x4f   : > { %2140 = vsyncadd (%p2448_p7), %s645_s19, 4294967232 }
  0x50   : > { %2142 = dma.done.wait (%p66_p2), [#allocation8], 128  }
  0x51   : > { %2144 = vsyncadd (%p66_p2), [#allocation8], 4294967168  ;;  %s2503_s11 = sand.u32 1, %s2159_s22  }
  0x52   : > { %2146 = dma.done.wait (%p2454_p8), %s645_s19, 48  }
  0x53   : > { %2148 = vsyncadd (%p2454_p8), %s645_s19, 4294967248  ;;  %p777_p13 = scmp.lt.s32.totalorder %s2179_s27, 1  ;;  %s2791_s2 = sld [smem:[#allocation32_spill]] }
  0x54   : > { %s2792_s19 = sld [smem:[#allocation34_spill]]  ;;  %s680_s29 = scalar_lea.vmem [#allocation11], %s2503_s11 }
  0x55   : > { %s2512_s15 = scalar_select %p777_p13, %s2179_s27, 1 }
  0x56   : > { %s2794_s26 = sld [smem:[#allocation37_spill]]  ;;  %p1662_p0 = scmp.ne.s32.totalorder %s2179_s27, 0 }
  0x57   : > { %s1720_s17 = sshll.u32 %s2512_s15, 4  ;;  %s2795_s20 = sld [smem:[#allocation38_spill]] }
  0x58   : > { %s1723_s28 = sshll.u32 %s2512_s15, 5  ;;  %s2796_s24 = sld [smem:[#allocation39_spill]] }
  0x59   : > { %s781_s21 = scalar_lea.vmem %s2791_s2, %s1720_s17  ;;  %s2797_s0 = sld [smem:[#allocation40_spill]] }
  0x5a   : > { %s2525_s30 = scalar_lea.vmem %s2792_s19, %s1720_s17  ;;  %s2798_s7 = sld [smem:[#allocation41_spill]] }
  0x5c   : > { %s2534_s23 = scalar_lea.vmem %s2794_s26, %s1720_s17  ;;  %s671_s26 = scalar_lea.vmem [#allocation10], %s2503_s11 }
  0x5d   : > { %s800_s22 = scalar_lea.vmem %s2795_s20, %s2512_s15  ;;  %s776_s17 = scalar_lea.vmem [#allocation12], %s2491_s18 }
  0x5e   : > { %s2544_s8 = scalar_lea.vmem %s2796_s24, %s1723_s28  ;;  %816 = sbr.rel (%p1662_p0) target bundleno = 103 (0x67), region = 108 }
  0x5f   : > { %s808_s1 = scalar_lea.vmem %s2797_s0, %s2512_s15 }
  0x60   : > { %s811_s13 = scalar_lea.vmem %s2798_s7, %s2512_s15 }
  0x63   : > { %v817_v0 = vld [vmem:[%s648_s14] sm:$0xf]  ;;  %vm819_vm0 = vcmask 261120  }
  0x64   : > { %v818_v1 = vunpack.c.l.bf16 %v817_v0 }
  0x66   : > { %820 = vst.msk [vmem:[#allocation2] sm:$0xff] %vm819_vm0, %v818_v1 }
  0x67 PF: > { %v1725_v2 = vld [vmem:[%s781_s21 + $0x8] sm:$0xff]  ;;  %v1724_v3 = vld [vmem:[%s781_s21] sm:$0xff]  ;;  %vm844_vm1 = vcmask 261120   ;;  %s2799_s2 = scalar_lea.vmem [#allocation9], %s2503_s11  ;;  %s2198_s7 = smov 96   ;;  %vm869_vm2 = vcmask 64512  }
  0x68   : > { %854 = vmatpush.bf16.msra.mxu0 %v1725_v2  ;;  %v1877_v6 = vld [vmem:[%s2799_s2] ss:$0 sm:$0xff]  ;;  %s2199_s24 = smov 104   ;;  %s2200_s0 = smov 120   ;;  %v823_v28 = vld [vmem:[#allocation7] sm:$0xff]  ;;  %vm906_vm3 = vcmask 1043456  }
  0x69   : > { %s2201_s14 = smov 88   ;;  %s2202_s20 = smov 80   ;;  %vm987_vm4 = vcmask 130112   ;;  %vm1049_vm5 = vcmask 195712   ;;  %vm1111_vm6 = vcmask 261312   ;;  %vm1305_vm0 = vcmask 523264  }
  0x6a   : > { %s2203_s21 = smov 72   ;;  %s2204_s9 = smov 112  }
  0x6b   : > { %s2205_s10 = smov 64   ;;  %s2206_s28 = smov 40  }
  0x6c   : > { %855 = vmatpush.bf16.msra.mxu0 %v1724_v3  ;;  %s2207_s16 = smov 56   ;;  %s2208_s12 = smov 48  }
  0x6d   : > { %v2558_v4 = vld [vmem:[#allocation2] sm:$0xff]  ;;  %s2209_s19 = smov 8   ;;  %s2210_s3 = smov 16  }
  0x6e   : > { %v822_v5 = vpack.c.bf16 %v2558_v4, %v2558_v4  ;;  %s2211_s6 = smov 24   ;;  %p1715_p2 = scmp.ne.s32.totalorder %s2179_s27, 1 }
  0x70   : > { %1671 = vmatmul.msk.bf16.vlgmr.msra.gmra.mxu0 %vm844_vm1, %v822_v5 }
  0xed   : > { %v857_v7 = vpop.f32.mrf.mxu0 }
  0xee   : > { %v858_v8 = vadd.f32 %v1877_v6, %v857_v7 }
  0xf0   : > { %v861_v9 = vmul.f32 0.35355338, %v858_v8  ;;  %v863_v10 = vpack.c.bf16 %v858_v8, %v858_v8 }
  0xf2   : > { %v862_v11 = vpack.c.bf16 %v861_v9, %v861_v9  ;;  %v865_v12 = vunpack.c.l.b16 %v863_v10 }
  0xf4   : > { %v2565_v13 = vpack.c.b16 %v865_v12, %v865_v12  ;;  %v925_v14 = vunpack.c.l.b16 %v862_v11 }
  0xf5   : > { %v859_v15 = vpop.f32.mrf.mxu0 }
  0xf6   : > { %867 = vrot.lane.b32.xlu0 %v2565_v13, %s2198_s7  ;;  %v926_v16 = vpack.c.b16 %v925_v14, %v925_v14 }
  0xf8   : > { %1051 = vrot.lane.b32.xlu2 %v926_v16, %s2199_s24  ;;  %927 = vrot.lane.b32.xlu1 %v926_v16, %s2200_s0  ;;  %s2800_s24 = scalar_lea.vmem %s2724_s5, %s2512_s15 }
  0xfe   : > { %929 = vrot.lane.b32.xlu0 %v2565_v13, %s2201_s14  ;;  %s2801_s14 = sld [smem:[#allocation35_spill]] }
 0x100   : > { %991 = vrot.lane.b32.xlu2 %v2565_v13, %s2202_s20  ;;  %1053 = vrot.lane.b32.xlu1 %v2565_v13, %s2203_s21 }
 0x106   : > { %989 = vrot.lane.b32.xlu0 %v926_v16, %s2204_s9 }
 0x152   : > { %v1052_v17 = vpop.permute.xlu2 %1051 }
 0x15a   : > { %v992_v18 = vpop.permute.xlu2 %991 }
 0x15b   : > { %v997_v19 = vsel %vm869_vm2, %v992_v18, 0 }
 0x15c   : > { %1006 = vmatpush.bf16.xpose.msrb.mxu0 %v997_v19 }
 0x168   : > { %v868_v20 = vpop.permute.xlu0 %867 }
 0x169   : > { %v874_v21 = vsel %vm869_vm2, %v868_v20, 0 }
 0x16a   : > { %883 = vmatpush.bf16.xpose.msra.mxu1 %v874_v21  ;;  %v928_v22 = vpop.permute.xlu1 %927 }
 0x170   : > { %v930_v23 = vpop.permute.xlu0 %929 }
 0x171   : > { %1672 = vmatmul.msk.bf16.vlgmr.msra.gmra.mxu1 %vm869_vm2, %v862_v11  ;;  %v935_v24 = vsel %vm869_vm2, %v930_v23, 0 }
 0x172   : > { %944 = vmatpush.bf16.xpose.msra.mxu3 %v935_v24  ;;  %v1054_v25 = vpop.permute.xlu1 %1053 }
 0x173   : > { %v1059_v26 = vsel %vm869_vm2, %v1054_v25, 0 }
 0x178   : > { %v990_v27 = vpop.permute.xlu0 %989 }
 0x179   : > { %1674 = vmatmul.msk.bf16.vlgmr.msra.gmra.mxu3 %vm869_vm2, %v928_v22  ;;  %1676 = vmatmul.msk.bf16.vlgmr.msrb.gmra.mxu0 %vm869_vm2, %v990_v27 }
 0x17a   : > { %1068 = vmatpush.bf16.xpose.msrb.mxu3 %v1059_v26 }
 0x189   : > { %1678 = vmatmul.msk.bf16.vlgmr.msrb.gmra.mxu3 %vm869_vm2, %v1052_v17 }
 0x1ee   : > { %v885_v29 = vpop.f32.mrf.mxu1 }
 0x1ef   : > { %v886_v30 = vadd.f32 %v885_v29, %v823_v28 }
 0x1f1   : > { %v889_v31 = vsel %vm869_vm2, %v886_v30, -inf }
 0x1f2   : > { %890 = vmax.xlane.f32.xlu1 %v889_v31 }
 0x1f6   : > { %v887_v32 = vpop.f32.mrf.mxu1  ;;  %v1008_v33 = vpop.f32.mrf.mxu0 }
 0x1f7   : > { %v1009_v38 = vadd.f32 %v1008_v33, %v823_v28 }
 0x1f9   : > { %v1012_v40 = vsel %vm869_vm2, %v1009_v38, -inf }
 0x1fc   : > { %v946_v34 = vpop.f32.mrf.mxu3 }
 0x1fd   : > { %v947_v35 = vadd.f32 %v946_v34, %v823_v28  ;;  %v1727_v34 = vld [vmem:[%s2525_s30 + $0x8] sm:$0xff] }
 0x1fe   : > { %v1010_v36 = vpop.f32.mrf.mxu0  ;;  %1144 = vmatpush.bf16.msra.mxu0 %v1727_v34 }
 0x1ff   : > { %v950_v37 = vsel %vm869_vm2, %v947_v35, -inf }
 0x200   : > { %951 = vmax.xlane.f32.xlu2 %v950_v37 }
 0x204   : > { %v948_v39 = vpop.f32.mrf.mxu3 }
 0x208   : > { %1013 = vmax.xlane.f32.xlu2 %v1012_v40 }
 0x20c   : > { %v1070_v41 = vpop.f32.mrf.mxu3 }
 0x20d   : > { %v1071_v42 = vadd.f32 %v1070_v41, %v823_v28  ;;  %v1878_v41 = vld [vmem:[%s2800_s24] ss:$0 sm:$0xff] }
 0x20f   : > { %v1074_v43 = vsel %vm869_vm2, %v1071_v42, -inf }
 0x210   : > { %1075 = vmax.xlane.f32.xlu0 %v1074_v43 }
 0x214   : > { %v1072_v44 = vpop.f32.mrf.mxu3 }
 0x220   : > { %901 = vrot.lane.b32.xlu2 %v2565_v13, %s2205_s10 }
 0x228   : > { %1086 = vrot.lane.b32.xlu2 %v2565_v13, %s2206_s28 }
 0x265   : > { %v891_v45 = vpop.xlane.xlu1 %890 }
 0x266   : > { %v892_v46 = vsub.f32 %v886_v30, %v891_v45 }
 0x268   : > { %v893_v47 = vmul.f32 1.442695, %v892_v46 }
 0x26a   : > { %1885 = vpow2.f32 %v893_v47  ;;  %v2212_v47 = vmov 32.0  }
 0x270   : > { %v1886_v48 = vpop.eup %1885 }
 0x271   : > { %v895_v49 = vsel %vm869_vm2, %v1886_v48, 0.0 }
 0x272   : > { %896 = vadd.xlane.f32.xlu1 %v895_v49 }
 0x273   : > { %v952_v50 = vpop.xlane.xlu2 %951 }
 0x274   : > { %v953_v53 = vsub.f32 %v947_v35, %v952_v50  ;;  %v1726_v35 = vld [vmem:[%s2525_s30] sm:$0xff] }
 0x275   : > { %1145 = vmatpush.bf16.msra.mxu0 %v1726_v35 }
 0x276   : > { %v954_v55 = vmul.f32 1.442695, %v953_v53 }
 0x27b   : > { %v1014_v51 = vpop.xlane.xlu2 %1013 }
 0x27c   : > { %v1015_v52 = vsub.f32 %v1009_v38, %v1014_v51 }
 0x27e   : > { %v1016_v54 = vmul.f32 1.442695, %v1015_v52 }
 0x280   : > { %1887 = vpow2.f32 %v1016_v54 }
 0x281   : > { %1889 = vpow2.f32 %v954_v55 }
 0x283   : > { %v902_v56 = vpop.permute.xlu2 %901  ;;  %v1076_v57 = vpop.xlane.xlu0 %1075 }
 0x284   : > { %v908_v58 = vsel %vm906_vm3, %v902_v56, 0  ;;  %v1077_v60 = vsub.f32 %v1071_v42, %v1076_v57 }
 0x285   : > { %917 = vmatpush.bf16.msra.mxu2 %v908_v58  ;;  %v1729_v58 = vld [vmem:[%s2534_s23 + $0x8] sm:$0xff] }
 0x286   : > { %v1888_v59 = vpop.eup %1887  ;;  %v1078_v62 = vmul.f32 1.442695, %v1077_v60 }
 0x287   : > { %v1018_v61 = vsel %vm869_vm2, %v1888_v59, 0.0  ;;  %v1890_v63 = vpop.eup %1889 }
 0x288   : > { %1019 = vadd.xlane.f32.xlu0 %v1018_v61  ;;  %1891 = vpow2.f32 %v1078_v62  ;;  %v956_v0 = vsel %vm869_vm2, %v1890_v63, 0.0 }
 0x28b   : > { %962 = vrot.lane.b32.xlu1 %v2565_v13, %s2207_s16  ;;  %v1087_v9 = vpop.permute.xlu2 %1086  ;;  %s2807_s16 = sld [smem:[#allocation44_spill]] (!%p1715_p2) }
 0x28c   : > { %v1092_v12 = vsel %vm906_vm3, %v1087_v9, 0 }
 0x28e   : > { %v1892_v1 = vpop.eup %1891 }
 0x28f   : > { %v1080_v2 = vsel %vm869_vm2, %v1892_v1, 0.0 }
 0x290   : > { %957 = vadd.xlane.f32.xlu0 %v956_v0 }
 0x298   : > { %1081 = vadd.xlane.f32.xlu0 %v1080_v2 }
 0x2ac   : > { %1024 = vrot.lane.b32.xlu0 %v2565_v13, %s2208_s12 }
 0x2e5   : > { %v897_v3 = vpop.xlane.xlu1 %896 }
 0x2e6   : > { %1893 = vrcp.f32 %v897_v3 }
 0x2ec   : > { %v1894_v5 = vpop.eup %1893 }
 0x2ed   : > { %v899_v6 = vmul.f32 %v1894_v5, %v1886_v48 }
 0x2ef   : > { %v900_v7 = vpack.c.bf16 %v899_v6, %v899_v6 }
 0x2f1   : > { %1673 = vmatmul.msk.bf16.vlgmr.msra.gmra.mxu2 %vm869_vm2, %v900_v7 }
 0x2fb   : > { %v1020_v8 = vpop.xlane.xlu0 %1019 }
 0x2fd   : > { %v963_v10 = vpop.permute.xlu1 %962 }
 0x2fe   : > { %v968_v11 = vsel %vm906_vm3, %v963_v10, 0 }
 0x2ff   : > { %977 = vmatpush.bf16.msrb.mxu2 %v968_v11 }
 0x303   : > { %1101 = vmatpush.bf16.msra.mxu2 %v1092_v12  ;;  %v958_v14 = vpop.xlane.xlu0 %957 }
 0x304   : > { %1895 = vrcp.f32 %v958_v14  ;;  %v1881_v14 = vld [vmem:[%s800_s22] ss:$0 sm:$0xff] }
 0x30a   : > { %v1896_v15 = vpop.eup %1895 }
 0x30b   : > { %v960_v13 = vmul.f32 %v1896_v15, %v1890_v63  ;;  %v1082_v16 = vpop.xlane.xlu0 %1081 }
 0x30c   : > { %1897 = vrcp.f32 %v1082_v16 }
 0x30d   : > { %v961_v17 = vpack.c.bf16 %v960_v13, %v960_v13  ;;  %1899 = vrcp.f32 %v1020_v8  ;;  %v1880_v8 = vld [vmem:[%s671_s26] ss:$0 sm:$0xff] }
 0x30e   : > { %1901 = vrcp.f32 %v2212_v47 }
 0x30f   : > { %1675 = vmatmul.msk.bf16.vlgmr.msrb.gmra.mxu2 %vm869_vm2, %v961_v17 }
 0x312   : > { %v1898_v18 = vpop.eup %1897 }
 0x313   : > { %v1084_v19 = vmul.f32 %v1898_v18, %v1892_v1  ;;  %v1900_v20 = vpop.eup %1899 }
 0x314   : > { %v1022_v21 = vmul.f32 %v1900_v20, %v1888_v59  ;;  %v1902_v48 = vpop.eup %1901  ;;  %v1728_v59 = vld [vmem:[%s2534_s23] sm:$0xff]  ;;  %s2802_s23 = scalar_lea.vmem %s2801_s14, %s2512_s15  ;;  %s2806_s15 = sld [smem:[#allocation43_spill]] (!%p1715_p2) }
 0x315   : > { %v1085_v22 = vpack.c.bf16 %v1084_v19, %v1084_v19  ;;  %v1158_v49 = vmul.f32 32.0, %v1902_v48  ;;  %vm1162_vm7 = vweird.f32 %v1902_v48  ;;  %v1879_v6 = vld [vmem:[%s2802_s23] ss:$0 sm:$0xff] }
 0x316   : > { %v1023_v25 = vpack.c.bf16 %v1022_v21, %v1022_v21  ;;  %v1733_v21 = vld [vmem:[%s2544_s8 + $0x18] sm:$0xff] }
 0x317   : > { %v1159_v50 = vsub.f32 1.0, %v1158_v49  ;;  %1313 = vmatpush.bf16.msra.mxu3 %v1733_v21 }
 0x319   : > { %v1160_v51 = vmul.f32 %v1902_v48, %v1159_v50 }
 0x31b   : > { %v1161_v52 = vadd.f32 %v1902_v48, %v1160_v51 }
 0x31d   : > { %v2610_v53 = vsel %vm1162_vm7, %v1902_v48, %v1161_v52 }
 0x31e   : > { %v1025_v23 = vpop.permute.xlu0 %1024 }
 0x31f   : > { %1679 = vmatmul.msk.bf16.vlgmr.msra.gmra.mxu2 %vm869_vm2, %v1085_v22  ;;  %v1030_v24 = vsel %vm906_vm3, %v1025_v23, 0  ;;  %v1732_v22 = vld [vmem:[%s2544_s8 + $0x10] sm:$0xff] }
 0x320   : > { %1039 = vmatpush.bf16.msrb.mxu1 %v1030_v24  ;;  %1314 = vmatpush.bf16.msra.mxu3 %v1732_v22 }
 0x323   : > { %1677 = vmatmul.msk.bf16.vlgmr.msrb.gmra.mxu1 %vm869_vm2, %v1023_v25  ;;  %v1731_v25 = vld [vmem:[%s2544_s8 + $0x8] sm:$0xff] }
 0x324   : > { %1221 = vmatpush.bf16.msra.mxu1 %v1729_v58  ;;  %1315 = vmatpush.bf16.msra.mxu3 %v1731_v25 }
 0x328   : > { %1222 = vmatpush.bf16.msra.mxu1 %v1728_v59 }
 0x374   : > { %v919_v26 = vpop.f32.mrf.mxu2 }
 0x375   : > { %923 = vst.msk [vmem:[#allocation3] sm:$0xff] %vm869_vm2, %v919_v26 }
 0x37c   : > { %v921_v27 = vpop.f32.mrf.mxu2 }
 0x392   : > { %v979_v28 = vpop.f32.mrf.mxu2 }
 0x393   : > { %984 = vrot.lane.b32.xlu1 %v979_v28, %s2209_s19 }
 0x39a   : > { %v981_v29 = vpop.f32.mrf.mxu2 }
 0x3a0   : > { %v1041_v30 = vpop.f32.mrf.mxu1 }
 0x3a1   : > { %1046 = vrot.lane.b32.xlu2 %v1041_v30, %s2210_s3  ;;  %v1730_v30 = vld [vmem:[%s2544_s8] sm:$0xff] }
 0x3a2   : > { %v1103_v31 = vpop.f32.mrf.mxu2  ;;  %1316 = vmatpush.bf16.msra.mxu3 %v1730_v30 }
 0x3a3   : > { %1108 = vrot.lane.b32.xlu1 %v1103_v31, %s2211_s6 }
 0x3a8   : > { %v1043_v32 = vpop.f32.mrf.mxu1 }
 0x3aa   : > { %v1105_v33 = vpop.f32.mrf.mxu2 }
 0x3fb   : > { %v1047_v37 = vpop.permute.xlu2 %1046 }
 0x405   : > { %v985_v36 = vpop.permute.xlu1 %984 }
 0x406   : > { %988 = vst.msk [vmem:[#allocation3] sm:$0xff] %vm987_vm4, %v985_v36 }
 0x407   : > { %1050 = vst.msk [vmem:[#allocation3] sm:$0xff] %vm1049_vm5, %v1047_v37 }
 0x415   : > { %v1109_v38 = vpop.permute.xlu1 %1108 }
 0x416   : > { %1112 = vst.msk [vmem:[#allocation3] sm:$0xff] %vm1111_vm6, %v1109_v38 }
 0x41d   : > { %v1113_v39 = vld [vmem:[#allocation3] sm:$0xff] }
 0x41e   : > { %v1114_v40 = vpack.c.bf16 %v1113_v39, %v1113_v39 }
 0x420   : > { %1688 = vmatmul.msk.bf16.vlgmr.msra.gmra.mxu0 %vm844_vm1, %v1114_v40 }
 0x49d   : > { %v1147_v42 = vpop.f32.mrf.mxu0 }
 0x49e   : > { %v1148_v43 = vadd.f32 %v1878_v41, %v1147_v42 }
 0x4a0   : > { %v1151_v44 = vadd.f32 %v1148_v43, %v2558_v4 }
 0x4a2   : > { %v1154_v45 = vsel %vm844_vm1, %v1151_v44, 0.0 }
 0x4a3   : > { %1155 = vadd.xlane.f32.xlu2 %v1154_v45 }
 0x4a5   : > { %v1149_v46 = vpop.f32.mrf.mxu0 }
 0x516   : > { %v1156_v54 = vpop.xlane.xlu2 %1155 }
 0x517   : > { %v1164_v55 = vmul.f32 %v2610_v53, %v1156_v54 }
 0x519   : > { %v1165_v4 = vsub.f32 %v1151_v44, %v1164_v55 }
 0x51b   : > { %v1166_v56 = vmul.f32 %v1165_v4, %v1165_v4 }
 0x51d   : > { %v1167_v57 = vsel %vm844_vm1, %v1166_v56, 0.0  ;;  %v1882_v56 = vld [vmem:[%s808_s1] ss:$0 sm:$0xff] }
 0x51e   : > { %1168 = vadd.xlane.f32.xlu1 %v1167_v57 }
 0x591   : > { %v1169_v60 = vpop.xlane.xlu1 %1168 }
 0x592   : > { %v1170_v61 = vmul.f32 %v1169_v60, %v2610_v53 }
 0x594   : > { %v1171_v62 = vadd.f32 1e-05, %v1170_v61 }
 0x596   : > { %1903 = vrsqrt.f32 %v1171_v62  ;;  %vm1178_vm9 = vweird.f32 %v1171_v62 }
 0x59c   : > { %v1904_v63 = vpop.eup %1903 }
 0x59d   : > { %v1173_v0 = vmul.f32 %v1904_v63, %v1171_v62  ;;  %vm1179_vm8 = vweird.f32 %v1904_v63 }
 0x59e   : > { %vm1180_vm10 = vmor %vm1178_vm9, %vm1179_vm8 }
 0x59f   : > { %v1174_v1 = vmul.f32 %v1904_v63, %v1173_v0 }
 0x5a1   : > { %v1175_v2 = vmul.f32 0.5, %v1174_v1 }
 0x5a3   : > { %v1176_v3 = vsub.f32 1.5, %v1175_v2 }
 0x5a5   : > { %v1177_v5 = vmul.f32 %v1904_v63, %v1176_v3 }
 0x5a7   : > { %v1181_v7 = vsel %vm1180_vm10, %v1904_v63, %v1177_v5 }
 0x5a8   : > { %v1182_v9 = vmul.f32 %v1181_v7, %v1165_v4 }
 0x5aa   : > { %v1186_v10 = vmul.f32 %v1879_v6, %v1182_v9 }
 0x5ac   : > { %v1190_v11 = vadd.f32 %v1880_v8, %v1186_v10 }
 0x5ae   : > { %v1191_v12 = vpack.c.bf16 %v1190_v11, %v1190_v11 }
 0x5b0   : > { %1697 = vmatmul.msk.bf16.vlgmr.msra.gmra.mxu1 %vm844_vm1, %v1191_v12 }
 0x62d   : > { %v1224_v15 = vpop.f32.mrf.mxu1 }
 0x62e   : > { %v1225_v13 = vadd.f32 %v1881_v14, %v1224_v15  ;;  %v1883_v14 = vld [vmem:[%s811_s13] ss:$0 sm:$0xff] }
 0x630   : > { %v1229_v16 = vmul.f32 0.70710677, %v1225_v13  ;;  %v1228_v52 = vmul.f32 0.5, %v1225_v13  ;;  %v1884_v13 = vld [vmem:[%s680_s29] ss:$0 sm:$0xff] }
 0x632   : > { %v1230_v17 = vand.u32 2147483647, %v1229_v16  ;;  %vm1263_vm15 = vcmp.ge.f32.partialorder %v1229_v16, 0.0 }
 0x634   : > { %v1231_v18 = vmul.f32 0.3275911, %v1230_v17  ;;  %v1257_v35 = vsub.f32 0.0, %v1230_v17 }
 0x635   : > { %v1226_v19 = vpop.f32.mrf.mxu1 }
 0x636   : > { %v1232_v20 = vadd.f32 1.0, %v1231_v18  ;;  %v1258_v38 = vmul.f32 %v1257_v35, %v1230_v17 }
 0x638   : > { %1905 = vrcp.f32 %v1232_v20  ;;  %v1244_v27 = vand.u32 2147483648, %v1232_v20  ;;  %v1242_v29 = vand.u32 2147483647, %v1232_v20  ;;  %vm1238_vm12 = vweird.f32 %v1232_v20 }
 0x639   : > { %v1259_v41 = vmul.f32 1.442695, %v1258_v38 }
 0x63a   : > { %v1245_v32 = vor.u32 1.1754944e-38, %v1244_v27  ;;  %vm1243_vm14 = vcmp.eq.f32.partialorder %v1242_v29, 8.507059e+37 }
 0x63b   : > { %1907 = vpow2.f32 %v1259_v41 }
 0x63e   : > { %v1906_v23 = vpop.eup %1905 }
 0x63f   : > { %v1234_v24 = vmul.f32 %v1906_v23, %v1232_v20  ;;  %vm1239_vm11 = vweird.f32 %v1906_v23 }
 0x640   : > { %vm1240_vm13 = vmor %vm1238_vm12, %vm1239_vm11 }
 0x641   : > { %v1235_v26 = vsub.f32 1.0, %v1234_v24  ;;  %v1908_v47 = vpop.eup %1907 }
 0x643   : > { %v1236_v28 = vmul.f32 %v1906_v23, %v1235_v26 }
 0x645   : > { %v1237_v31 = vadd.f32 %v1906_v23, %v1236_v28 }
 0x647   : > { %v1241_v33 = vsel %vm1240_vm13, %v1906_v23, %v1237_v31 }
 0x648   : > { %v1246_v34 = vsel %vm1243_vm14, %v1245_v32, %v1241_v33 }
 0x649   : > { %v1248_v36 = vmul.f32 1.0614054, %v1246_v34 }
 0x64b   : > { %v1249_v37 = vadd.f32 -1.4531521, %v1248_v36 }
 0x64d   : > { %v1250_v39 = vmul.f32 %v1249_v37, %v1246_v34 }
 0x64f   : > { %v1251_v40 = vadd.f32 1.4214138, %v1250_v39 }
 0x651   : > { %v1252_v42 = vmul.f32 %v1251_v40, %v1246_v34 }
 0x653   : > { %v1253_v43 = vadd.f32 -0.28449672, %v1252_v42 }
 0x655   : > { %v1254_v44 = vmul.f32 %v1253_v43, %v1246_v34 }
 0x657   : > { %v1255_v45 = vadd.f32 0.2548296, %v1254_v44 }
 0x659   : > { %v1256_v46 = vmul.f32 %v1255_v45, %v1246_v34 }
 0x65b   : > { %v1261_v48 = vmul.f32 %v1908_v47, %v1256_v46 }
 0x65d   : > { %v1262_v49 = vsub.f32 1.0, %v1261_v48 }
 0x65f   : > { %v1264_v50 = vsub.f32 0.0, %v1262_v49 }
 0x661   : > { %v1265_v51 = vsel %vm1263_vm15, %v1262_v49, %v1264_v50 }
 0x662   : > { %v1266_v54 = vadd.f32 1.0, %v1265_v51 }
 0x664   : > { %v1267_v55 = vmul.f32 %v1266_v54, %v1228_v52 }
 0x666   : > { %v1268_v4 = vpack.c.bf16 %v1267_v55, %v1267_v55 }
 0x668   : > { %1714 = vmatmul.msk.bf16.vlgmr.msra.gmra.mxu3 %vm1305_vm0, %v1268_v4 }
 0x6eb   : > { %v1318_v57 = vpop.f32.mrf.mxu3 }
 0x6ec   : > { %v1319_v58 = vadd.f32 %v1882_v56, %v1318_v57 }
 0x6ee   : > { %v1322_v59 = vadd.f32 %v1319_v58, %v1190_v11 }
 0x6f0   : > { %v1325_v60 = vsel %vm844_vm1, %v1322_v59, 0.0 }
 0x6f1   : > { %1326 = vadd.xlane.f32.xlu0 %v1325_v60 }
 0x6f3   : > { %v1320_v61 = vpop.f32.mrf.mxu3 }
 0x764   : > { %v1327_v62 = vpop.xlane.xlu0 %1326 }
 0x765   : > { %v1328_v63 = vmul.f32 %v1327_v62, %v2610_v53 }
 0x767   : > { %v1329_v0 = vsub.f32 %v1322_v59, %v1328_v63 }
 0x769   : > { %v1330_v1 = vmul.f32 %v1329_v0, %v1329_v0 }
 0x76b   : > { %v1331_v2 = vsel %vm844_vm1, %v1330_v1, 0.0 }
 0x76c   : > { %1332 = vadd.xlane.f32.xlu2 %v1331_v2 }
 0x7df   : > { %v1333_v3 = vpop.xlane.xlu2 %1332 }
 0x7e0   : > { %v1334_v5 = vmul.f32 %v1333_v3, %v2610_v53 }
 0x7e2   : > { %v1335_v6 = vadd.f32 1e-05, %v1334_v5 }
 0x7e4   : > { %1909 = vrsqrt.f32 %v1335_v6  ;;  %vm1342_vm3 = vweird.f32 %v1335_v6 }
 0x7ea   : > { %v1910_v7 = vpop.eup %1909 }
 0x7eb   : > { %v1337_v8 = vmul.f32 %v1910_v7, %v1335_v6  ;;  %vm1343_vm2 = vweird.f32 %v1910_v7 }
 0x7ec   : > { %vm1344_vm4 = vmor %vm1342_vm3, %vm1343_vm2 }
 0x7ed   : > { %v1338_v9 = vmul.f32 %v1910_v7, %v1337_v8 }
 0x7ef   : > { %v1339_v10 = vmul.f32 0.5, %v1338_v9 }
 0x7f1   : > { %v1340_v11 = vsub.f32 1.5, %v1339_v10 }
 0x7f3   : > { %v1341_v12 = vmul.f32 %v1910_v7, %v1340_v11 }
 0x7f5   : > { %v1345_v15 = vsel %vm1344_vm4, %v1910_v7, %v1341_v12 }
 0x7f6   : > { %v1346_v16 = vmul.f32 %v1345_v15, %v1329_v0 }
 0x7f8   : > { %v1350_v17 = vmul.f32 %v1883_v14, %v1346_v16  ;;  %1359 = sbr.rel (%p1715_p2) target bundleno = 2316 (0x90c), region = 112 }
 0x7fa   : > { %v1354_v18 = vadd.f32 %v1884_v13, %v1350_v17 }
 0x7fc   : > { %1355 = vst.msk [vmem:[#allocation2] sm:$0xff] %vm844_vm1, %v1354_v18 }
 0x7fd   : > { %v1362_v19 = vsel %vm844_vm1, %v1354_v18, 0.0  ;;  %v1911_v34 = vld [vmem:[%s2806_s15] ss:$0 sm:$0xff] }
 0x7fe   : > { %1363 = vadd.xlane.f32.xlu0 %v1362_v19 }
 0x871   : > { %v1364_v20 = vpop.xlane.xlu0 %1363 }
 0x872   : > { %v1365_v21 = vmul.f32 %v1364_v20, %v2610_v53 }
 0x874   : > { %v1366_v22 = vsub.f32 %v1354_v18, %v1365_v21 }
 0x876   : > { %v1367_v23 = vmul.f32 %v1366_v22, %v1366_v22 }
 0x878   : > { %v1368_v24 = vsel %vm844_vm1, %v1367_v23, 0.0  ;;  %vm1393_vm1 = vcmask 257024  }
 0x879   : > { %1369 = vadd.xlane.f32.xlu0 %v1368_v24 }
 0x8ec   : > { %v1370_v25 = vpop.xlane.xlu0 %1369 }
 0x8ed   : > { %v1371_v26 = vmul.f32 %v1370_v25, %v2610_v53  ;;  %v1912_v53 = vld [vmem:[%s2807_s16] ss:$0 sm:$0xff] }
 0x8ef   : > { %v1372_v27 = vadd.f32 1e-05, %v1371_v26 }
 0x8f1   : > { %1913 = vrsqrt.f32 %v1372_v27  ;;  %vm1379_vm6 = vweird.f32 %v1372_v27 }
 0x8f7   : > { %v1914_v28 = vpop.eup %1913 }
 0x8f8   : > { %v1374_v29 = vmul.f32 %v1914_v28, %v1372_v27  ;;  %vm1380_vm5 = vweird.f32 %v1914_v28 }
 0x8f9   : > { %vm1381_vm7 = vmor %vm1379_vm6, %vm1380_vm5 }
 0x8fa   : > { %v1375_v30 = vmul.f32 %v1914_v28, %v1374_v29 }
 0x8fc   : > { %v1376_v31 = vmul.f32 0.5, %v1375_v30 }
 0x8fe   : > { %v1377_v32 = vsub.f32 1.5, %v1376_v31 }
 0x900   : > { %v1378_v33 = vmul.f32 %v1914_v28, %v1377_v32 }
 0x902   : > { %v1382_v35 = vsel %vm1381_vm7, %v1914_v28, %v1378_v33 }
 0x903   : > { %v1383_v36 = vmul.f32 %v1382_v35, %v1366_v22 }
 0x905   : > { %v1387_v37 = vmul.f32 %v1911_v34, %v1383_v36 }
 0x907   : > { %v1391_v38 = vadd.f32 %v1912_v53, %v1387_v37 }
 0x909   : > { %v1392_v39 = vpack.c.bf16 %v1391_v38, %v1391_v38 }
 0x90b   : > { %1394 = vst.msk [vmem:[%s776_s17] sm:$0xf] %vm1393_vm1, %v1392_v39 }
 0x90c PF: > { %s2808_s12 = sld [smem:[#allocation21_spill]]  ;;  %s1408_s24 = sshll.u32 %s776_s17, 4  ;;  %s1409_s24 = int_to_ptr.vmem [resolvable:$true] %s1408_s24 }
 0x90d   : > { %s2809_s2 = sld [smem:[#allocation45_spill]]  ;;  %s2810_s0 = sand.u32 1, %s2171_s25  }
 0x90e   : > { %s1396_s14 = scalar_lea.sflag [#allocation6], %s2810_s0 }
 0x912   : > { %s1717_s19 = sshll.u32 %s2808_s12, 2 }
 0x913   : > { %s1406_s7 = scalar_lea.hbm %s2809_s2, %s1717_s19  ;;  %s2085_s22 = scalar_lea.hbm %s2809_s2, 8 }
 0x914   : > { %s1410_s30 = sshll.u32 %s1406_s7, 4  ;;  %s1411_s30 = int_to_ptr.hbm [resolvable:$true] %s1410_s30 }
 0x915   : > { %s2079_s23 = sshra.s32 %s1411_s30, 4  ;;  %s2080_s23 = int_to_ptr.hbm [resolvable:$true] %s2079_s23 }
 0x916   : > { %s2081_s20 = scalar_lea.hbm %s2080_s23, 4  ;;  %p2086_p7 = scmp.lt.s32.totalorder %s2080_s23, %s2809_s2 }
 0x917   : > { %p2082_p4 = scmp.ne.s32.totalorder %s2080_s23, %s2081_s20  ;;  %p2087_p8 = scmp.lt.s32.totalorder %s2085_s22, %s2081_s20 }
 0x919   : > { %p2083_p5 = pnand %p2082_p4, %p2461_p9  ;;  %p2088_p10 = por %p2087_p8, %p2086_p7 }
 0x91b   : > { %p2084_p6 = pneg %p2083_p5 }
 0x91d   : > { %p2089_p3 = pnand %p2088_p10, %p2084_p6 }
 0x91f   : > { %2092 = shalt.err (!%p2089_p3)
}
 0x920   : > { %1746 = dma.vmem_to_hbm [thread:$0]  (%p2461_p9), %s1409_s24, 64, %s1411_s30, %s1396_s14  }
 0x921 PF: > { %s2811_s18 = sld [smem:[#allocation24_spill]] }
 0x922   : > { %s2812_s17 = sld [smem:[#allocation19_spill]] }
 0x927   : > { %p1772_p12 = scmp.ge.s32.totalorder %s2811_s18, 2 }
 0x928   : > { %s1422_s10 = sand.u32 1, %s2812_s17  }
 0x929   : > { %p1766_p1 = pnand %p1772_p12, %p2394_p11  ;;  %s1423_s28 = scalar_lea.sflag [#allocation6], %s1422_s10 }
 0x92b   : > { %p1767_p13 = pneg %p1766_p1 }
 0x92d   : > { %2150 = dma.done.wait (%p1767_p13), %s1423_s28, 64  }
 0x92e   : > { %2152 = vsyncadd (%p1767_p13), %s1423_s28, 4294967232  ;;  %s33_s0 = sadd.s32 1, %s2811_s18   ;;  %s2814_s21 = sld [smem:[#allocation17_spill]] }
 0x92f   : > { %p30_p0 = scmp.ge.s32.totalorder %s33_s0, 6   ;;  %s2815_s22 = sld [smem:[#allocation18_spill]] }
 0x930   : > { %s2816_s23 = sld [smem:[#allocation27_spill]]  ;;  %s2823_s24 = smov %s2171_s25 }
 0x931   : > { %s2817_s4 = sld [smem:[#allocation20_spill]] }
 0x932   : > { %s2818_s26 = sld [smem:[#allocation28_spill]] }
 0x933   : > { %s2819_s27 = sld [smem:[#allocation22_spill]]  ;;  %32 = sbr.rel (!%p30_p0) target bundleno = 27 (0x1b), region = 201 }
 0x934   : > { %s2820_s28 = sld [smem:[#allocation23_spill]] }
 0x935   : > { %s2821_s29 = sld [smem:[#allocation25_spill]] }
 0x936   : > { %s2822_s30 = sld [smem:[#allocation26_spill]] }
 0x937   : > { %s2824_s25 = smov %s2817_s4 }
 0x938   :  { %1429 = vsyncpa [#allocation5], 1 }
 0x939   :  { %1431 = vsyncpa [#allocation5 + $0x1], 1 }
 0x93a   :  { %1432 = vsyncpa [#allocation8], 1 }
 0x93b   :  { %1433 = vsyncpa [#allocation6], 1 }
 0x93c   :  { %1435 = vsyncpa [#allocation6 + $0x1], 1 }

</bundles_post_ra>
